<compile_context>
chip_gen: v7x
topology: tpu7x:2x2x1
jax: 0.10.0
libtpu: 0.0.40
codegen_flags: <defaults>
</compile_context>

<pallas_src>
import jax
import jax.numpy as jnp
from jax import lax
from jax.experimental import pallas as pl
from jax.experimental.pallas import tpu as pltpu

HIDDEN1 = 1024
HIDDEN2 = 1024


def _round_up(x, m):
    return ((x + m - 1) // m) * m


def _pick_batch_tile(b, block_b):
    """Row-tile size: multiple of 8, <= block_b, <= b, and (when possible)
    small enough that the grid has >= 2 steps so the batch axis can shard
    across v7x's two TensorCores."""
    if b <= 8:
        return 8
    tb = _round_up((b + 1) // 2, 8)     # aim for >= 2 grid steps
    tb = min(tb, block_b)               # VMEM / per-step granularity cap
    tb = min(tb, (b // 8) * 8)          # never exceed the array extent
    return max(tb, 8)


# ----------------------------------------------------------------------------
# Pallas kernel: Linear -> ReLU -> Linear -> ReLU -> Linear -> Sigmoid
# (Dropout layers are identity at inference time.)
#   x_ref:   (TB, H)      f32 activations (one batch tile)
#   w1_ref:  (H, 1024)    bf16   (resident, single-buffered)
#   b1_ref:  (1, 1024)    f32    (resident)
#   w2_ref:  (1024, 1024) bf16   (resident, single-buffered)
#   b2_ref:  (1, 1024)    f32    (resident)
#   w3t_ref: (1, 1024)    f32    (resident; transposed final layer)
#   b3_ref:  (1, 1)       f32    (SMEM scalar)
#   o_ref:   (TB, 1)      f32
# ----------------------------------------------------------------------------
def _mlp_head_kernel(x_ref, w1_ref, b1_ref, w2_ref, b2_ref, w3t_ref, b3_ref, o_ref):
    x = x_ref[...].astype(jnp.bfloat16)                               # (TB, H)

    h1 = jnp.dot(x, w1_ref[...], preferred_element_type=jnp.float32) + b1_ref[...]
    h1 = jnp.maximum(h1, 0.0)                                         # ReLU (f32)

    h2 = jnp.dot(h1.astype(jnp.bfloat16), w2_ref[...],
                 preferred_element_type=jnp.float32) + b2_ref[...]
    h2 = jnp.maximum(h2, 0.0)                                         # ReLU (f32)

    # Final (1024 -> 1) layer as VPU multiply + lane reduction (XLU), avoiding
    # an MXU matmul with N=1 and the (1024, 1) layout.  b3 read from SMEM.
    logits = jnp.sum(h2 * w3t_ref[...], axis=-1, keepdims=True) + b3_ref[0, 0]
    o_ref[...] = jax.nn.sigmoid(logits)                               # (TB, 1)


def mlp_head(x, w1_bf16, b1, w2_bf16, b2, w3t, b3, *, block_b=512):
    """x: (B, H) f32; w1_bf16: (H,1024) bf16, w2_bf16: (1024,1024) bf16,
    w3t: (1,1024) f32, b3: (1,1) f32  ->  (B, 1) f32 probabilities."""
    B, H = x.shape

    # Only a tiny pad up to 8 rows for very small batches (sublane minimum).
    # For B >= 8 the ragged last tile is handled by Pallas boundary clipping,
    # so no wrapper-side HBM roundtrip of the activation matrix is needed.
    bp = max(B, 8)
    if bp != B:
        x = jnp.pad(x, ((0, bp - B), (0, 0)))

    tb = _pick_batch_tile(bp, block_b)
    n_tiles = -(-bp // tb)

    def resident(shape):
        # Constant index map: DMA'd once, stays resident across batch tiles.
        # Single-buffered (Buffered(1)) since it is never re-fetched.
        return pl.BlockSpec(shape, lambda i: (0,) * len(shape),
                            pipeline_mode=pl.Buffered(1))

    flops = 2 * bp * (H * HIDDEN1 + HIDDEN1 * HIDDEN2 + HIDDEN2)
    bytes_accessed = (
        x.size * 4 + w1_bf16.size * 2 + w2_bf16.size * 2
        + (b1.size + b2.size + w3t.size + b3.size) * 4 + bp * 4
    )

    out_p = pl.pallas_call(
        _mlp_head_kernel,
        out_shape=jax.ShapeDtypeStruct((bp, 1), jnp.float32),
        grid_spec=pltpu.PrefetchScalarGridSpec(
            num_scalar_prefetch=0,
            grid=(n_tiles,),
            in_specs=[
                pl.BlockSpec((tb, H), lambda i: (i, 0)),         # x: tiled over batch
                resident((H, HIDDEN1)),                          # w1 (bf16)
                resident((1, HIDDEN1)),                          # b1
                resident((HIDDEN1, HIDDEN2)),                    # w2 (bf16)
                resident((1, HIDDEN2)),                          # b2
                resident((1, HIDDEN2)),                          # w3^T
                pl.BlockSpec(memory_space=pltpu.MemorySpace.SMEM),  # b3 scalar
            ],
            out_specs=pl.BlockSpec((tb, 1), lambda i: (i, 0)),
        ),
        compiler_params=pltpu.CompilerParams(
            dimension_semantics=("parallel",),          # shards over v7x's 2 TCs
            vmem_limit_bytes=32 << 20,                  # safe on v5e/v6e/v7x
        ),
        cost_estimate=pl.CostEstimate(
            flops=flops,
            transcendentals=bp,                         # one sigmoid per row
            bytes_accessed=bytes_accessed,
        ),
    )(x, w1_bf16, b1, w2_bf16, b2, w3t, b3)

    return out_p[:B]


# ----------------------------------------------------------------------------
# Stand-in recurrent_clf: simple tanh Elman RNN, returns last hidden state.
# (plain JAX glue — the real recurrent_clf is not defined in the source file)
# ----------------------------------------------------------------------------
def recurrent_clf_forward(inputs, wx, wh, bh):
    """inputs: (B, T, D_in) -> (B, H)."""
    B, T, D = inputs.shape
    H = wh.shape[0]
    h0 = jnp.zeros((B, H), jnp.float32)

    def step(h, x_t):
        h_new = jnp.tanh(x_t @ wx + h @ wh + bh)
        return h_new, None

    xs = jnp.swapaxes(inputs, 0, 1)          # (T, B, D)
    h_last, _ = lax.scan(step, h0, xs)
    return h_last                            # (B, H)


# ----------------------------------------------------------------------------
# Full module wrapper
# ----------------------------------------------------------------------------
def no_cluster_labels_forward(params, inputs, labels):
    # `labels` intentionally unused, matching the PyTorch forward signature.
    del labels
    feats = recurrent_clf_forward(inputs, params["rnn_wx"], params["rnn_wh"], params["rnn_bh"])
    # TODO(synk): start the W1/W2 HBM->VMEM DMA in a tiny preceding pallas_call
    # (semaphore + VMEM-ref outputs) so the one-shot weight load hides behind
    # the recurrent pass for small batches.
    return mlp_head(
        feats,
        params["w1_bf16"], params["b1"],
        params["w2_bf16"], params["b2"],
        params["w3t"], params["b3"],
    )


def prepare_params(params):
    """One-time weight preparation (call OUTSIDE the per-step forward): bf16
    casts of the two big weights and lane-dense W3^T, so no per-call HBM
    cast/reshape traffic remains in the jitted forward."""
    p = dict(params)
    p["w1_bf16"] = params["w1"].astype(jnp.bfloat16)
    p["w2_bf16"] = params["w2"].astype(jnp.bfloat16)
    p["w3t"] = jnp.reshape(params["w3"], (1, HIDDEN2)).astype(jnp.float32)
    return p


def init_params(key, d_in, output_size):
    ks = jax.random.split(key, 9)

    def lin(k, fan_in, fan_out):
        bound = 1.0 / jnp.sqrt(fan_in)
        return jax.random.uniform(k, (fan_in, fan_out), jnp.float32, -bound, bound)

    return {
        # stand-in recurrent classifier params
        "rnn_wx": lin(ks[0], d_in, output_size),
        "rnn_wh": lin(ks[1], output_size, output_size),
        "rnn_bh": jnp.zeros((output_size,), jnp.float32),
        # MLP head (matches nn.Linear shapes, stored as (in, out))
        "w1": lin(ks[2], output_size, HIDDEN1),
        "b1": jax.random.uniform(ks[3], (1, HIDDEN1), jnp.float32,
                                 -1.0 / jnp.sqrt(output_size), 1.0 / jnp.sqrt(output_size)),
        "w2": lin(ks[4], HIDDEN1, HIDDEN2),
        "b2": jax.random.uniform(ks[5], (1, HIDDEN2), jnp.float32,
                                 -1.0 / jnp.sqrt(HIDDEN1), 1.0 / jnp.sqrt(HIDDEN1)),
        "w3": lin(ks[6], HIDDEN2, 1),
        "b3": jax.random.uniform(ks[7], (1, 1), jnp.float32,
                                 -1.0 / jnp.sqrt(HIDDEN2), 1.0 / jnp.sqrt(HIDDEN2)),
    }


if __name__ == "__main__":
    B, T, D_IN, OUTPUT_SIZE = 2, 8, 16, 32

    key = jax.random.PRNGKey(0)
    k_inp, k_lab, k_par = jax.random.split(key, 3)

    inputs = jax.random.normal(k_inp, (B, T, D_IN), jnp.float32)
    labels = (jax.random.uniform(k_lab, (B, 1)) > 0.5).astype(jnp.float32)

    # One-time weight preparation outside the forward path.
    params = prepare_params(init_params(k_par, D_IN, OUTPUT_SIZE))

    fwd = jax.jit(no_cluster_labels_forward)
    out = jax.block_until_ready(fwd(params, inputs, labels))

    # sanity: (B, 1) probabilities in (0, 1)
    assert out.shape == (B, 1)
    assert bool(jnp.all((out > 0.0) & (out < 1.0)))

    # reference check against plain-JAX f32 MLP head (relaxed tolerance: the
    # kernel uses bf16 weights/activations for the two big matmuls).
    feats = recurrent_clf_forward(inputs, params["rnn_wx"], params["rnn_wh"], params["rnn_bh"])
    ref = jax.nn.sigmoid(
        jnp.maximum(jnp.maximum(feats @ params["w1"] + params["b1"], 0.0)
                    @ params["w2"] + params["b2"], 0.0)
        @ params["w3"] + params["b3"])
    assert bool(jnp.allclose(out, ref, atol=2e-2, rtol=2e-2))

    print("KERNEL_OK")
</pallas_src>

<mosaic_0001>
module attributes {stable_mosaic.version = 11 : i64} {
  func.func @_mlp_head_kernel(%arg0: i32, %arg1: memref<8x32xf32, #tpu.memory_space<vmem>>, %arg2: memref<32x1024xbf16, #tpu.memory_space<vmem>>, %arg3: memref<1x1024xf32, #tpu.memory_space<vmem>>, %arg4: memref<1024x1024xbf16, #tpu.memory_space<vmem>>, %arg5: memref<1x1024xf32, #tpu.memory_space<vmem>>, %arg6: memref<1x1024xf32, #tpu.memory_space<vmem>>, %arg7: memref<1x1xf32, #tpu.memory_space<smem>>, %arg8: memref<8x1xf32, #tpu.memory_space<vmem>>) attributes {dimension_semantics = [#tpu.dimension_semantics<parallel>], iteration_bounds = array<i64: 1>, scalar_prefetch = 0 : i64, scratch_operands = 0 : i64, tpu.core_type = #tpu.core_type<tc>, window_params = [{transform_indices = @transform_0, window_bounds = array<i64: 8, 32>}, {pipeline_mode = #tpu.pipeline_mode<synchronous>, transform_indices = @transform_1, window_bounds = array<i64: 32, 1024>}, {pipeline_mode = #tpu.pipeline_mode<synchronous>, transform_indices = @transform_2, window_bounds = array<i64: 1, 1024>}, {pipeline_mode = #tpu.pipeline_mode<synchronous>, transform_indices = @transform_3, window_bounds = array<i64: 1024, 1024>}, {pipeline_mode = #tpu.pipeline_mode<synchronous>, transform_indices = @transform_4, window_bounds = array<i64: 1, 1024>}, {pipeline_mode = #tpu.pipeline_mode<synchronous>, transform_indices = @transform_5, window_bounds = array<i64: 1, 1024>}, {transform_indices = @transform_6, window_bounds = array<i64: 1, 1>}, {transform_indices = @transform_7, window_bounds = array<i64: 8, 1>}]} {
    %c0 = arith.constant 0 : index
    %c0_0 = arith.constant 0 : index
    %0 = vector.load %arg1[%c0, %c0_0] : memref<8x32xf32, #tpu.memory_space<vmem>>, vector<8x32xf32>
    %1 = arith.truncf %0 : vector<8x32xf32> to vector<8x32xbf16>
    %c0_1 = arith.constant 0 : index
    %c0_2 = arith.constant 0 : index
    %2 = vector.load %arg2[%c0_1, %c0_2] : memref<32x1024xbf16, #tpu.memory_space<vmem>>, vector<32x1024xbf16>
    %cst = arith.constant dense<0.000000e+00> : vector<8x1024xf32>
    %3 = tpu.matmul %1, %2, %cst {dimension_numbers = #tpu.dot_dimension_numbers<[1], [0], [0], [1], [0, 0, 1, 1], [], []>} : vector<8x32xbf16>, vector<32x1024xbf16>, vector<8x1024xf32> -> vector<8x1024xf32>
    %c0_3 = arith.constant 0 : index
    %c0_4 = arith.constant 0 : index
    %4 = vector.load %arg3[%c0_3, %c0_4] : memref<1x1024xf32, #tpu.memory_space<vmem>>, vector<1x1024xf32>
    %5 = vector.broadcast %4 : vector<1x1024xf32> to vector<8x1024xf32>
    %6 = arith.addf %3, %5 : vector<8x1024xf32>
    %cst_5 = arith.constant 0.000000e+00 : f32
    %7 = vector.broadcast %cst_5 : f32 to vector<8x1024xf32>
    %8 = arith.maximumf %6, %7 : vector<8x1024xf32>
    %9 = arith.truncf %8 : vector<8x1024xf32> to vector<8x1024xbf16>
    %c0_6 = arith.constant 0 : index
    %c0_7 = arith.constant 0 : index
    %10 = vector.load %arg4[%c0_6, %c0_7] : memref<1024x1024xbf16, #tpu.memory_space<vmem>>, vector<1024x1024xbf16>
    %cst_8 = arith.constant dense<0.000000e+00> : vector<8x1024xf32>
    %11 = tpu.matmul %9, %10, %cst_8 {dimension_numbers = #tpu.dot_dimension_numbers<[1], [0], [0], [1], [0, 0, 1, 1], [], []>} : vector<8x1024xbf16>, vector<1024x1024xbf16>, vector<8x1024xf32> -> vector<8x1024xf32>
    %c0_9 = arith.constant 0 : index
    %c0_10 = arith.constant 0 : index
    %12 = vector.load %arg5[%c0_9, %c0_10] : memref<1x1024xf32, #tpu.memory_space<vmem>>, vector<1x1024xf32>
    %13 = vector.broadcast %12 : vector<1x1024xf32> to vector<8x1024xf32>
    %14 = arith.addf %11, %13 : vector<8x1024xf32>
    %cst_11 = arith.constant 0.000000e+00 : f32
    %15 = vector.broadcast %cst_11 : f32 to vector<8x1024xf32>
    %16 = arith.maximumf %14, %15 : vector<8x1024xf32>
    %c0_12 = arith.constant 0 : index
    %c0_13 = arith.constant 0 : index
    %17 = vector.load %arg6[%c0_12, %c0_13] : memref<1x1024xf32, #tpu.memory_space<vmem>>, vector<1x1024xf32>
    %18 = vector.broadcast %17 : vector<1x1024xf32> to vector<8x1024xf32>
    %19 = arith.mulf %16, %18 : vector<8x1024xf32>
    %cst_14 = arith.constant dense<0.000000e+00> : vector<8xf32>
    %20 = vector.multi_reduction <add>, %19, %cst_14 [1] : vector<8x1024xf32> to vector<8xf32>
    %21 = vector.shape_cast %20 : vector<8xf32> to vector<8x1xf32>
    %c0_15 = arith.constant 0 : index
    %c0_16 = arith.constant 0 : index
    %22 = memref.load %arg7[%c0_15, %c0_16] : memref<1x1xf32, #tpu.memory_space<smem>>
    %23 = vector.broadcast %22 : f32 to vector<8x1xf32>
    %24 = arith.addf %21, %23 : vector<8x1xf32>
    %25 = arith.negf %24 : vector<8x1xf32>
    %26 = math.exp %25 : vector<8x1xf32>
    %cst_17 = arith.constant 1.000000e+00 : f32
    %27 = vector.broadcast %cst_17 : f32 to vector<8x1xf32>
    %28 = arith.addf %27, %26 : vector<8x1xf32>
    %29 = arith.divf %27, %28 : vector<8x1xf32>
    %c0_18 = arith.constant 0 : index
    %c0_19 = arith.constant 0 : index
    %30 = vector.load %arg8[%c0_18, %c0_19] : memref<8x1xf32, #tpu.memory_space<vmem>>, vector<8x1xf32>
    tpu.vector_store %arg8[%c0_18, %c0_19], %29 {strides = array<i32>} : memref<8x1xf32, #tpu.memory_space<vmem>>, vector<8x1xf32>,
    return
  }
  func.func @transform_0(%arg0: i32) -> (i32, i32) {
    %c0_i32 = arith.constant 0 : i32
    %c0_i32_0 = arith.constant 0 : i32
    return %arg0, %c0_i32 : i32, i32
  }
  func.func @transform_1(%arg0: i32) -> (i32, i32) {
    %c0_i32 = arith.constant 0 : i32
    %c0_i32_0 = arith.constant 0 : i32
    %c0_i32_1 = arith.constant 0 : i32
    return %c0_i32, %c0_i32_0 : i32, i32
  }
  func.func @transform_2(%arg0: i32) -> (i32, i32) {
    %c0_i32 = arith.constant 0 : i32
    %c0_i32_0 = arith.constant 0 : i32
    %c0_i32_1 = arith.constant 0 : i32
    return %c0_i32, %c0_i32_0 : i32, i32
  }
  func.func @transform_3(%arg0: i32) -> (i32, i32) {
    %c0_i32 = arith.constant 0 : i32
    %c0_i32_0 = arith.constant 0 : i32
    %c0_i32_1 = arith.constant 0 : i32
    return %c0_i32, %c0_i32_0 : i32, i32
  }
  func.func @transform_4(%arg0: i32) -> (i32, i32) {
    %c0_i32 = arith.constant 0 : i32
    %c0_i32_0 = arith.constant 0 : i32
    %c0_i32_1 = arith.constant 0 : i32
    return %c0_i32, %c0_i32_0 : i32, i32
  }
  func.func @transform_5(%arg0: i32) -> (i32, i32) {
    %c0_i32 = arith.constant 0 : i32
    %c0_i32_0 = arith.constant 0 : i32
    %c0_i32_1 = arith.constant 0 : i32
    return %c0_i32, %c0_i32_0 : i32, i32
  }
  func.func @transform_6(%arg0: i32) -> (i32, i32) {
    %c0_i32 = arith.constant 0 : i32
    %c0_i32_0 = arith.constant 0 : i32
    %c0_i32_1 = arith.constant 0 : i32
    return %c0_i32, %c0_i32_0 : i32, i32
  }
  func.func @transform_7(%arg0: i32) -> (i32, i32) {
    %c0_i32 = arith.constant 0 : i32
    %c0_i32_0 = arith.constant 0 : i32
    return %arg0, %c0_i32 : i32, i32
  }
}

</mosaic_0001>

<bundles_post_ra>
// kernel: custom-call
= control target key start
LH: loop header
LB: loop body
LE: loop exit
PB: predicated region body
PF: predicated region fallthrough
CT: control target
= control target key end

     0   :  { %s6_s0 = inlined_call_operand.vmem [shape: f32[2,32], index: 0, kind: output, shape index: {}]  }

// kernel: no_cluster_labels_forward.1
= control target key start
LH: loop header
LB: loop body
LE: loop exit
PB: predicated region body
PF: predicated region fallthrough
CT: control target
= control target key end

     0   :  { %13 = vsyncpa [#allocation4], 0  ;;  %s5253_s0 = inlined_call_operand.vmem [shape: f32[8,32], index: 0, kind: input, shape index: {}]   ;;  %s5254_s1 = inlined_call_operand.hbm [shape: bf16[32,1024], index: 1, kind: input, shape index: {}]   ;;  %s5255_s2 = inlined_call_operand.hbm [shape: f32[1,1024], index: 2, kind: input, shape index: {}]   ;;  %s5256_s3 = inlined_call_operand.hbm [shape: bf16[1024,1024], index: 3, kind: input, shape index: {}]   ;;  %s5257_s4 = inlined_call_operand.hbm [shape: f32[1,1024], index: 4, kind: input, shape index: {}]   ;;  %s5258_s5 = inlined_call_operand.hbm [shape: f32[1,1024], index: 5, kind: input, shape index: {}]   ;;  %s5259_s6 = inlined_call_operand.<no memory space> [shape: f32[1,1], index: 6, kind: input, shape index: {}]   ;;  %s5260_s7 = inlined_call_operand.vmem [shape: f32[8,1], index: 7, kind: output, shape index: {}]  }
   0x1   :  { %14 = vsyncpa [#allocation6], 0 }
   0x2   :  { %15 = vsyncpa [#allocation9], 0  ;;  %s4987_s24 = smov [#allocation5]   ;;  %s4988_s26 = smov [#allocation8]  }
   0x3   :  { %s36_s25 = sshll.u32 %s4987_s24, 4  ;;  %s58_s27 = sshll.u32 %s4988_s26, 4  ;;  %s37_s25 = int_to_ptr.vmem [resolvable:$true] %s36_s25  ;;  %s59_s27 = int_to_ptr.vmem [resolvable:$true] %s58_s27 }
   0x4   :  { %s4871_s30 = scalar_lea.hbm %s5255_s2, 128 }
   0x5   :  { %p4872_p0 = scmp.ne.s32.totalorder %s5255_s2, %s4871_s30  ;;  %p4875_p1 = scmp.lt.u32.totalorder %s4871_s30, %s5255_s2 }
   0x7   :  { %p4877_p2 = pnand %p4875_p1, %p4872_p0 }
   0x9   :  { %4880 = shalt.err (!%p4877_p2)
}
   0xa   :  { %s4881_s12 = scalar_lea.vmem %s37_s25, 128  ;;  %p4886_p4 = scmp.lt.s32.totalorder %s37_s25, %s37_s25 }
   0xb   :  { %p4882_p3 = scmp.ne.s32.totalorder %s37_s25, %s4881_s12  ;;  %p4887_p5 = scmp.lt.s32.totalorder %s4881_s12, %s4881_s12 }
   0xd   :  { %p4888_p6 = por %p4887_p5, %p4886_p4 }
   0xf   :  { %p4889_p7 = pnand %p4888_p6, %p4882_p3 }
  0x11   :  { %4892 = shalt.err (!%p4889_p7)
}
  0x12   :  { %39 = dma.hbm_to_vmem [thread:$0]  %s5255_s2, 128, %s37_s25, [#allocation6]  }
  0x13   :  { %s4893_s17 = scalar_lea.hbm %s5257_s4, 128 }
  0x14   :  { %p4894_p8 = scmp.ne.s32.totalorder %s5257_s4, %s4893_s17  ;;  %p4897_p9 = scmp.lt.u32.totalorder %s4893_s17, %s5257_s4 }
  0x16   :  { %p4899_p10 = pnand %p4897_p9, %p4894_p8 }
  0x18   :  { %4902 = shalt.err (!%p4899_p10)
}
  0x19   :  { %s4903_s22 = scalar_lea.vmem %s59_s27, 128  ;;  %p4908_p12 = scmp.lt.s32.totalorder %s59_s27, %s59_s27 }
  0x1a   :  { %p4904_p11 = scmp.ne.s32.totalorder %s59_s27, %s4903_s22  ;;  %p4909_p13 = scmp.lt.s32.totalorder %s4903_s22, %s4903_s22 }
  0x1c   :  { %p4910_p0 = por %p4909_p13, %p4908_p12 }
  0x1e   :  { %p4911_p1 = pnand %p4910_p0, %p4904_p11 }
  0x20   :  { %4914 = shalt.err (!%p4911_p1)
}
  0x21   :  { %61 = dma.hbm_to_vmem [thread:$0]  %s5257_s4, 128, %s59_s27, [#allocation9]  }
  0x22   :  { %s4989_s24 = smov [#allocation3]   ;;  %s4915_s29 = scalar_lea.hbm %s5254_s1, 2048 }
  0x23   :  { %s23_s25 = sshll.u32 %s4989_s24, 4  ;;  %p4916_p2 = scmp.ne.s32.totalorder %s5254_s1, %s4915_s29  ;;  %s24_s25 = int_to_ptr.vmem [resolvable:$true] %s23_s25 }
  0x24   :  { %p4919_p3 = scmp.lt.u32.totalorder %s4915_s29, %s5254_s1 }
  0x26   :  { %p4921_p4 = pnand %p4919_p3, %p4916_p2 }
  0x28   :  { %4924 = shalt.err (!%p4921_p4)
}
  0x29   :  { %s4925_s11 = scalar_lea.vmem %s24_s25, 2048  ;;  %p4930_p6 = scmp.lt.s32.totalorder %s24_s25, %s24_s25 }
  0x2a   :  { %p4926_p5 = scmp.ne.s32.totalorder %s24_s25, %s4925_s11  ;;  %p4931_p7 = scmp.lt.s32.totalorder %s4925_s11, %s4925_s11 }
  0x2c   :  { %p4932_p8 = por %p4931_p7, %p4930_p6 }
  0x2e   :  { %p4933_p9 = pnand %p4932_p8, %p4926_p5 }
  0x30   :  { %4936 = shalt.err (!%p4933_p9)
}
  0x31   :  { %s4990_s4 = smov 512   ;;  %s4991_s27 = smov 32  }
  0x32   :  { %29 = dma.hbm_to_vmem [thread:$0]  %s5254_s1, 2048, %s24_s25, [#allocation4], %s4990_s4, %s4990_s4, %s4991_s27  }
  0x33   :  { %s4992_s14 = smov [#allocation7]   ;;  %s4993_s16 = smov [#allocation10]  }
  0x34   :  { %s45_s15 = sshll.u32 %s4992_s14, 4  ;;  %s68_s17 = sshll.u32 %s4993_s16, 4  ;;  %s46_s15 = int_to_ptr.vmem [resolvable:$true] %s45_s15  ;;  %s69_s17 = int_to_ptr.vmem [resolvable:$true] %s68_s17 }
  0x35   :  { %s4937_s20 = scalar_lea.hbm %s5256_s3, 65536 }
  0x36   :  { %p4938_p10 = scmp.ne.s32.totalorder %s5256_s3, %s4937_s20  ;;  %p4941_p11 = scmp.lt.u32.totalorder %s4937_s20, %s5256_s3 }
  0x38   :  { %p4943_p12 = pnand %p4941_p11, %p4938_p10 }
  0x3a   :  { %4946 = shalt.err (!%p4943_p12)
}
  0x3b   :  { %s4947_s1 = scalar_lea.vmem %s46_s15, 65536  ;;  %p4952_p0 = scmp.lt.s32.totalorder %s46_s15, %s46_s15 }
  0x3c   :  { %p4948_p13 = scmp.ne.s32.totalorder %s46_s15, %s4947_s1  ;;  %p4953_p1 = scmp.lt.s32.totalorder %s4947_s1, %s4947_s1 }
  0x3e   :  { %p4954_p2 = por %p4953_p1, %p4952_p0 }
  0x40   :  { %p4955_p3 = pnand %p4954_p2, %p4948_p13 }
  0x42   :  { %4958 = shalt.err (!%p4955_p3)
}
  0x43   :  { %51 = dma.hbm_to_vmem [thread:$0]  %s5256_s3, 65536, %s46_s15, [#allocation6], %s4990_s4, %s4990_s4, %s4991_s27  }
  0x44   :  { %s4959_s29 = scalar_lea.hbm %s5258_s5, 128 }
  0x45   :  { %p4960_p4 = scmp.ne.s32.totalorder %s5258_s5, %s4959_s29  ;;  %p4963_p5 = scmp.lt.u32.totalorder %s4959_s29, %s5258_s5 }
  0x47   :  { %p4965_p6 = pnand %p4963_p5, %p4960_p4 }
  0x49   :  { %4968 = shalt.err (!%p4965_p6)
}
  0x4a   :  { %s4969_s11 = scalar_lea.vmem %s69_s17, 128  ;;  %p4974_p8 = scmp.lt.s32.totalorder %s69_s17, %s69_s17 }
  0x4b   :  { %p4970_p7 = scmp.ne.s32.totalorder %s69_s17, %s4969_s11  ;;  %p4975_p9 = scmp.lt.s32.totalorder %s4969_s11, %s4969_s11 }
  0x4d   :  { %p4976_p10 = por %p4975_p9, %p4974_p8 }
  0x4f   :  { %p4977_p11 = pnand %p4976_p10, %p4970_p7 }
  0x51   :  { %4980 = shalt.err (!%p4977_p11)
}
  0x52   :  { %71 = dma.hbm_to_vmem [thread:$0]  %s5258_s5, 128, %s69_s17, [#allocation9]  }
  0x53   :  { %4981 = dma.done.wait [#allocation4], 2048  }
  0x54   :  { %4982 = vsyncadd [#allocation4], 4294965248 }
  0x55   :  { %4983 = dma.done.wait [#allocation6], 65664  }
  0x56   :  { %4984 = vsyncadd [#allocation6], 4294901632 }
  0x57   :  { %4985 = dma.done.wait [#allocation9], 256  }
  0x58   :  { %4986 = vsyncadd [#allocation9], 4294967040  ;;  %v4994_v0 = vmov 0   ;;  %v92_v1 = vld [vmem:[#allocation3] sm:$0xff]  ;;  %v93_v7 = vld [vmem:[#allocation3 + $0x8] sm:$0xff]  ;;  %vm230_vm0 = vcmask 261120  }
  0x59   :  { %266 = vmatprep.mubr.bf16.mxu0 %v4994_v0  ;;  %307 = vmatprep.mubr.bf16.mxu1 %v4994_v0  ;;  %v96_v2 = vld [vmem:[#allocation3 + $0x20] sm:$0xff]  ;;  %v97_v9 = vld [vmem:[#allocation3 + $0x28] sm:$0xff]  ;;  %v94_v15 = vld [vmem:[#allocation3 + $0x10] sm:$0xff]  ;;  %vm4260_vm1 = vcmask 7168  }
  0x5a   :  { %v100_v3 = vld [vmem:[#allocation3 + $0x40] sm:$0xff]  ;;  %v4270_v4 = vcombine.high %v92_v1, %v96_v2  ;;  %v4269_v5 = vcombine.low %v92_v1, %v96_v2  ;;  %v101_v10 = vld [vmem:[#allocation3 + $0x48] sm:$0xff]  ;;  %v4272_v12 = vcombine.high %v93_v7, %v97_v9  ;;  %v4271_v13 = vcombine.low %v93_v7, %v97_v9  ;;  %v98_v16 = vld [vmem:[#allocation3 + $0x30] sm:$0xff] }
  0x5b   :  { %v104_v6 = vld [vmem:[#allocation3 + $0x60] sm:$0xff]  ;;  %v105_v11 = vld [vmem:[#allocation3 + $0x68] sm:$0xff]  ;;  %v95_v19 = vld [vmem:[#allocation3 + $0x18] sm:$0xff]  ;;  %v4274_v21 = vcombine.high %v94_v15, %v98_v16  ;;  %v4273_v27 = vcombine.low %v94_v15, %v98_v16 }
  0x5c   :  { %v4278_v8 = vcombine.high %v100_v3, %v104_v6  ;;  %234 = vmatprep.subr.bf16.mxu0 %v4270_v4  ;;  %v4280_v14 = vcombine.high %v101_v10, %v105_v11  ;;  %v4277_v17 = vcombine.low %v100_v3, %v104_v6  ;;  %v90_v18 = vld [vmem:[%s5253_s0] sm:$0xff]  ;;  %v99_v20 = vld [vmem:[#allocation3 + $0x38] sm:$0xff]  ;;  %275 = vmatprep.subr.bf16.mxu1 %v4272_v12  ;;  %v102_v23 = vld [vmem:[#allocation3 + $0x50] sm:$0xff] }
  0x5d   :  { %235 = vmatpush1.bf16.msra.mxu0 %v4269_v5  ;;  %276 = vmatpush1.bf16.msra.mxu1 %v4271_v13  ;;  %v4279_v22 = vcombine.low %v101_v10, %v105_v11  ;;  %v106_v24 = vld [vmem:[#allocation3 + $0x70] sm:$0xff]  ;;  %v91_v25 = vpack.c.bf16 %v90_v18, %v90_v18  ;;  %v4276_v26 = vcombine.high %v95_v19, %v99_v20  ;;  %v103_v28 = vld [vmem:[#allocation3 + $0x58] sm:$0xff]  ;;  %v414_v32 = vld [vmem:[#allocation7] sm:$0xff] }
  0x5e   :  { %236 = vmatprep.subr.bf16.mxu0 %v4278_v8  ;;  %277 = vmatprep.subr.bf16.mxu1 %v4280_v14  ;;  %v107_v29 = vld [vmem:[#allocation3 + $0x78] sm:$0xff]  ;;  %v4282_v30 = vcombine.high %v102_v23, %v106_v24  ;;  %v4275_v31 = vcombine.low %v95_v19, %v99_v20  ;;  %v418_v33 = vld [vmem:[#allocation7 + $0x20] sm:$0xff]  ;;  %v4281_v35 = vcombine.low %v102_v23, %v106_v24  ;;  %v415_v36 = vld [vmem:[#allocation7 + $0x8] sm:$0xff] }
  0x5f   :  { %v4284_v34 = vcombine.high %v103_v28, %v107_v29  ;;  %v419_v37 = vld [vmem:[#allocation7 + $0x28] sm:$0xff]  ;;  %v4290_v38 = vcombine.high %v414_v32, %v418_v33  ;;  %v4283_v39 = vcombine.low %v103_v28, %v107_v29  ;;  %v422_v40 = vld [vmem:[#allocation7 + $0x40] sm:$0xff]  ;;  %v4289_v43 = vcombine.low %v414_v32, %v418_v33 }
  0x60   :  { %v426_v41 = vld [vmem:[#allocation7 + $0x60] sm:$0xff]  ;;  %v4292_v42 = vcombine.high %v415_v36, %v419_v37  ;;  %v423_v44 = vld [vmem:[#allocation7 + $0x48] sm:$0xff]  ;;  %v4291_v47 = vcombine.low %v415_v36, %v419_v37 }
  0x61   :  { %237 = vmatpush1.bf16.msra.mxu0 %v4277_v17  ;;  %278 = vmatpush1.bf16.msra.mxu1 %v4279_v22  ;;  %v427_v45 = vld [vmem:[#allocation7 + $0x68] sm:$0xff]  ;;  %v4298_v46 = vcombine.high %v422_v40, %v426_v41  ;;  %v430_v48 = vld [vmem:[#allocation7 + $0x80] sm:$0xff]  ;;  %v4297_v51 = vcombine.low %v422_v40, %v426_v41 }
  0x62   :  { %316 = vmatprep.subr.bf16.mxu0 %v4274_v21  ;;  %357 = vmatprep.subr.bf16.mxu1 %v4276_v26  ;;  %v434_v49 = vld [vmem:[#allocation7 + $0xa0] sm:$0xff]  ;;  %v4300_v50 = vcombine.high %v423_v44, %v427_v45  ;;  %v431_v52 = vld [vmem:[#allocation7 + $0x88] sm:$0xff]  ;;  %v4299_v55 = vcombine.low %v423_v44, %v427_v45 }
  0x63   :  { %v435_v53 = vld [vmem:[#allocation7 + $0xa8] sm:$0xff]  ;;  %v4306_v54 = vcombine.high %v430_v48, %v434_v49  ;;  %v438_v56 = vld [vmem:[#allocation7 + $0xc0] sm:$0xff]  ;;  %v4305_v59 = vcombine.low %v430_v48, %v434_v49 }
  0x64   :  { %4285 = vmatmul.mubr.msk.bf16.vlgmr.msra.gmra.mrb[0].mxu0 %vm230_vm0, %v91_v25  ;;  %4286 = vmatmul.mubr.msk.bf16.vlgmr.msra.gmra.mrb[0].mxu1 %vm230_vm0, %v91_v25  ;;  %v442_v57 = vld [vmem:[#allocation7 + $0xe0] sm:$0xff]  ;;  %v4308_v58 = vcombine.high %v431_v52, %v435_v53  ;;  %v439_v60 = vld [vmem:[#allocation7 + $0xc8] sm:$0xff]  ;;  %v4307_v63 = vcombine.low %v431_v52, %v435_v53 }
  0x65   :  { %317 = vmatpush1.bf16.msra.mxu0 %v4273_v27  ;;  %348 = vmatprep.mubr.bf16.mxu0 %v4994_v0  ;;  %v443_v61 = vld [vmem:[#allocation7 + $0xe8] sm:$0xff]  ;;  %v4314_v62 = vcombine.high %v438_v56, %v442_v57  ;;  %v450_v1 = vld [vmem:[#allocation7 + $0x120] sm:$0xff]  ;;  %v4313_v3 = vcombine.low %v438_v56, %v442_v57 }
  0x66   :  { %318 = vmatprep.subr.bf16.mxu0 %v4282_v30  ;;  %358 = vmatpush1.bf16.msra.mxu1 %v4275_v31  ;;  %v4316_v2 = vcombine.high %v439_v60, %v443_v61  ;;  %v447_v4 = vld [vmem:[#allocation7 + $0x108] sm:$0xff]  ;;  %v4315_v7 = vcombine.low %v439_v60, %v443_v61  ;;  %v454_v8 = vld [vmem:[#allocation7 + $0x140] sm:$0xff] }
  0x67   :  { %389 = vmatprep.mubr.bf16.mxu1 %v4994_v0  ;;  %359 = vmatprep.subr.bf16.mxu1 %v4284_v34  ;;  %v446_v0 = vld [vmem:[#allocation7 + $0x100] sm:$0xff]  ;;  %v451_v5 = vld [vmem:[#allocation7 + $0x128] sm:$0xff] }
  0x68   :  { %v4322_v6 = vcombine.high %v446_v0, %v450_v1  ;;  %v458_v9 = vld [vmem:[#allocation7 + $0x160] sm:$0xff]  ;;  %v4324_v10 = vcombine.high %v447_v4, %v451_v5  ;;  %v4321_v11 = vcombine.low %v446_v0, %v450_v1  ;;  %v455_v12 = vld [vmem:[#allocation7 + $0x148] sm:$0xff]  ;;  %v4323_v15 = vcombine.low %v447_v4, %v451_v5 }
  0x69   :  { %319 = vmatpush1.bf16.msra.mxu0 %v4281_v35  ;;  %v459_v13 = vld [vmem:[#allocation7 + $0x168] sm:$0xff]  ;;  %v4330_v14 = vcombine.high %v454_v8, %v458_v9  ;;  %v462_v16 = vld [vmem:[#allocation7 + $0x180] sm:$0xff]  ;;  %v4329_v19 = vcombine.low %v454_v8, %v458_v9 }
  0x6a   :  { %3528 = vmatprep.subr.bf16.mxu0 %v4290_v38  ;;  %360 = vmatpush1.bf16.msra.mxu1 %v4283_v39  ;;  %v466_v17 = vld [vmem:[#allocation7 + $0x1a0] sm:$0xff]  ;;  %v4332_v18 = vcombine.high %v455_v12, %v459_v13  ;;  %v463_v20 = vld [vmem:[#allocation7 + $0x188] sm:$0xff]  ;;  %v4331_v23 = vcombine.low %v455_v12, %v459_v13 }
  0x6b   :  { %3692 = vmatprep.subr.bf16.mxu1 %v4292_v42  ;;  %v467_v21 = vld [vmem:[#allocation7 + $0x1a8] sm:$0xff]  ;;  %v4338_v22 = vcombine.high %v462_v16, %v466_v17  ;;  %v470_v24 = vld [vmem:[#allocation7 + $0x1c0] sm:$0xff]  ;;  %v4337_v27 = vcombine.low %v462_v16, %v466_v17 }
  0x6c   :  { %4287 = vmatmul.mubr.msk.bf16.vlgmr.msra.gmra.mrb[4].mxu0 %vm230_vm0, %v91_v25  ;;  %v4340_v26 = vcombine.high %v463_v20, %v467_v21  ;;  %v471_v28 = vld [vmem:[#allocation7 + $0x1c8] sm:$0xff]  ;;  %v4339_v31 = vcombine.low %v463_v20, %v467_v21  ;;  %v478_v32 = vld [vmem:[#allocation7 + $0x200] sm:$0xff] }
  0x6d   :  { %3529 = vmatpush1.bf16.msra.mxu0 %v4289_v43  ;;  %4288 = vmatmul.mubr.msk.bf16.vlgmr.msra.gmra.mrb[4].mxu1 %vm230_vm0, %v91_v25  ;;  %v474_v25 = vld [vmem:[#allocation7 + $0x1e0] sm:$0xff]  ;;  %v475_v29 = vld [vmem:[#allocation7 + $0x1e8] sm:$0xff] }
  0x6e   :  { %3530 = vmatprep.subr.bf16.mxu0 %v4298_v46  ;;  %3693 = vmatpush1.bf16.msra.mxu1 %v4291_v47  ;;  %v4346_v30 = vcombine.high %v470_v24, %v474_v25  ;;  %v482_v33 = vld [vmem:[#allocation7 + $0x220] sm:$0xff]  ;;  %v4348_v34 = vcombine.high %v471_v28, %v475_v29  ;;  %v4345_v35 = vcombine.low %v470_v24, %v474_v25  ;;  %v479_v36 = vld [vmem:[#allocation7 + $0x208] sm:$0xff] }
  0x6f   :  { %3694 = vmatprep.subr.bf16.mxu1 %v4300_v50  ;;  %v483_v37 = vld [vmem:[#allocation7 + $0x228] sm:$0xff]  ;;  %v4354_v38 = vcombine.high %v478_v32, %v482_v33  ;;  %v4347_v39 = vcombine.low %v471_v28, %v475_v29  ;;  %v486_v40 = vld [vmem:[#allocation7 + $0x240] sm:$0xff]  ;;  %v4353_v43 = vcombine.low %v478_v32, %v482_v33 }
  0x70   :  { %v490_v41 = vld [vmem:[#allocation7 + $0x260] sm:$0xff]  ;;  %v4356_v42 = vcombine.high %v479_v36, %v483_v37  ;;  %v487_v44 = vld [vmem:[#allocation7 + $0x248] sm:$0xff]  ;;  %v4355_v47 = vcombine.low %v479_v36, %v483_v37 }
  0x71   :  { %3531 = vmatpush1.bf16.msra.mxu0 %v4297_v51  ;;  %v491_v45 = vld [vmem:[#allocation7 + $0x268] sm:$0xff]  ;;  %v4362_v46 = vcombine.high %v486_v40, %v490_v41  ;;  %v494_v48 = vld [vmem:[#allocation7 + $0x280] sm:$0xff]  ;;  %v4361_v51 = vcombine.low %v486_v40, %v490_v41 }
  0x72   :  { %3532 = vmatprep.subr.bf16.mxu0 %v4306_v54  ;;  %3695 = vmatpush1.bf16.msra.mxu1 %v4299_v55  ;;  %v498_v49 = vld [vmem:[#allocation7 + $0x2a0] sm:$0xff]  ;;  %v4364_v50 = vcombine.high %v487_v44, %v491_v45  ;;  %v495_v52 = vld [vmem:[#allocation7 + $0x288] sm:$0xff]  ;;  %v4363_v55 = vcombine.low %v487_v44, %v491_v45 }
  0x73   :  { %3696 = vmatprep.subr.bf16.mxu1 %v4308_v58  ;;  %v499_v53 = vld [vmem:[#allocation7 + $0x2a8] sm:$0xff]  ;;  %v4370_v54 = vcombine.high %v494_v48, %v498_v49  ;;  %v502_v56 = vld [vmem:[#allocation7 + $0x2c0] sm:$0xff] }
  0x74   :  { %v506_v57 = vld [vmem:[#allocation7 + $0x2e0] sm:$0xff]  ;;  %v4372_v58 = vcombine.high %v495_v52, %v499_v53  ;;  %v503_v60 = vld [vmem:[#allocation7 + $0x2c8] sm:$0xff] }
  0x75   :  { %3533 = vmatpush1.bf16.msra.mxu0 %v4305_v59  ;;  %v4369_v59 = vcombine.low %v494_v48, %v498_v49  ;;  %v507_v61 = vld [vmem:[#allocation7 + $0x2e8] sm:$0xff]  ;;  %v510_v0 = vld [vmem:[#allocation7 + $0x300] sm:$0xff] }
  0x76   :  { %3534 = vmatprep.subr.bf16.mxu0 %v4314_v62  ;;  %3697 = vmatpush1.bf16.msra.mxu1 %v4307_v63  ;;  %v4378_v62 = vcombine.high %v502_v56, %v506_v57  ;;  %v4371_v63 = vcombine.low %v495_v52, %v499_v53  ;;  %v514_v1 = vld [vmem:[#allocation7 + $0x320] sm:$0xff]  ;;  %v511_v4 = vld [vmem:[#allocation7 + $0x308] sm:$0xff] }
  0x77   :  { %3698 = vmatprep.subr.bf16.mxu1 %v4316_v2  ;;  %v4380_v2 = vcombine.high %v503_v60, %v507_v61  ;;  %v515_v5 = vld [vmem:[#allocation7 + $0x328] sm:$0xff]  ;;  %v518_v8 = vld [vmem:[#allocation7 + $0x340] sm:$0xff] }
  0x78   :  { %v522_v9 = vld [vmem:[#allocation7 + $0x360] sm:$0xff]  ;;  %v519_v12 = vld [vmem:[#allocation7 + $0x348] sm:$0xff] }
  0x79   :  { %3535 = vmatpush1.bf16.msra.mxu0 %v4313_v3  ;;  %v4377_v3 = vcombine.low %v502_v56, %v506_v57  ;;  %v523_v13 = vld [vmem:[#allocation7 + $0x368] sm:$0xff]  ;;  %v4393_v17 = vcombine.low %v518_v8, %v522_v9  ;;  %v530_v20 = vld [vmem:[#allocation7 + $0x3a0] sm:$0xff] }
  0x7a   :  { %3536 = vmatprep.subr.bf16.mxu0 %v4322_v6  ;;  %3699 = vmatpush1.bf16.msra.mxu1 %v4315_v7  ;;  %v4386_v6 = vcombine.high %v510_v0, %v514_v1  ;;  %v4379_v7 = vcombine.low %v503_v60, %v507_v61  ;;  %v4396_v16 = vcombine.high %v519_v12, %v523_v13  ;;  %v527_v21 = vld [vmem:[#allocation7 + $0x388] sm:$0xff]  ;;  %v538_v28 = vld [vmem:[#allocation7 + $0x3e0] sm:$0xff] }
  0x7b   :  { %3700 = vmatprep.subr.bf16.mxu1 %v4324_v10  ;;  %v4388_v10 = vcombine.high %v511_v4, %v515_v5  ;;  %v535_v29 = vld [vmem:[#allocation7 + $0x3c8] sm:$0xff]  ;;  %v546_v36 = vld [vmem:[#allocation7 + $0x420] sm:$0xff] }
  0x7c   :  { %v543_v37 = vld [vmem:[#allocation7 + $0x408] sm:$0xff]  ;;  %v550_v60 = vld [vmem:[#allocation7 + $0x440] sm:$0xff] }
  0x7d   :  { %3537 = vmatpush1.bf16.msra.mxu0 %v4321_v11  ;;  %v4385_v11 = vcombine.low %v510_v0, %v514_v1  ;;  %v551_v0 = vld [vmem:[#allocation7 + $0x448] sm:$0xff] }
  0x7e   :  { %3538 = vmatprep.subr.bf16.mxu0 %v4330_v14  ;;  %3701 = vmatpush1.bf16.msra.mxu1 %v4323_v15  ;;  %v4394_v14 = vcombine.high %v518_v8, %v522_v9  ;;  %v4387_v15 = vcombine.low %v511_v4, %v515_v5  ;;  %v555_v1 = vld [vmem:[#allocation7 + $0x468] sm:$0xff] }
  0x7f   :  { %3702 = vmatprep.subr.bf16.mxu1 %v4332_v18  ;;  %v4395_v18 = vcombine.low %v519_v12, %v523_v13  ;;  %v4428_v9 = vcombine.high %v551_v0, %v555_v1  ;;  %v559_v12 = vld [vmem:[#allocation7 + $0x488] sm:$0xff] }
  0x80   :  { %v563_v13 = vld [vmem:[#allocation7 + $0x4a8] sm:$0xff] }
  0x81   :  { %3539 = vmatpush1.bf16.msra.mxu0 %v4329_v19  ;;  %v526_v19 = vld [vmem:[#allocation7 + $0x380] sm:$0xff] }
  0x82   :  { %3540 = vmatprep.subr.bf16.mxu0 %v4338_v22  ;;  %3703 = vmatpush1.bf16.msra.mxu1 %v4331_v23  ;;  %v4402_v22 = vcombine.high %v526_v19, %v530_v20  ;;  %v531_v23 = vld [vmem:[#allocation7 + $0x3a8] sm:$0xff]  ;;  %v4401_v24 = vcombine.low %v526_v19, %v530_v20 }
  0x83   :  { %3704 = vmatprep.subr.bf16.mxu1 %v4340_v26  ;;  %v4403_v25 = vcombine.low %v527_v21, %v531_v23  ;;  %v4404_v26 = vcombine.high %v527_v21, %v531_v23  ;;  %v4436_v21 = vcombine.high %v559_v12, %v563_v13 }
  0x85   :  { %3541 = vmatpush1.bf16.msra.mxu0 %v4337_v27  ;;  %v534_v27 = vld [vmem:[#allocation7 + $0x3c0] sm:$0xff] }
  0x86   :  { %3542 = vmatprep.subr.bf16.mxu0 %v4346_v30  ;;  %3705 = vmatpush1.bf16.msra.mxu1 %v4339_v31  ;;  %v4410_v30 = vcombine.high %v534_v27, %v538_v28  ;;  %v539_v31 = vld [vmem:[#allocation7 + $0x3e8] sm:$0xff]  ;;  %v4409_v32 = vcombine.low %v534_v27, %v538_v28  ;;  %v4435_v28 = vcombine.low %v559_v12, %v563_v13 }
  0x87   :  { %3706 = vmatprep.subr.bf16.mxu1 %v4348_v34  ;;  %v4411_v33 = vcombine.low %v535_v29, %v539_v31  ;;  %v4412_v34 = vcombine.high %v535_v29, %v539_v31  ;;  %v574_v31 = vld [vmem:[#allocation7 + $0x500] sm:$0xff]  ;;  %v607_v12 = vld [vmem:[#allocation7 + $0x608] sm:$0xff] }
  0x88   :  { %v611_v13 = vld [vmem:[#allocation7 + $0x628] sm:$0xff] }
  0x89   :  { %3543 = vmatpush1.bf16.msra.mxu0 %v4345_v35  ;;  %v542_v35 = vld [vmem:[#allocation7 + $0x400] sm:$0xff] }
  0x8a   :  { %3544 = vmatprep.subr.bf16.mxu0 %v4354_v38  ;;  %3707 = vmatpush1.bf16.msra.mxu1 %v4347_v39  ;;  %v4418_v38 = vcombine.high %v542_v35, %v546_v36  ;;  %v547_v39 = vld [vmem:[#allocation7 + $0x428] sm:$0xff]  ;;  %v4417_v40 = vcombine.low %v542_v35, %v546_v36 }
  0x8b   :  { %3708 = vmatprep.subr.bf16.mxu1 %v4356_v42  ;;  %v4419_v41 = vcombine.low %v543_v37, %v547_v39  ;;  %v4420_v42 = vcombine.high %v543_v37, %v547_v39  ;;  %v582_v39 = vld [vmem:[#allocation7 + $0x540] sm:$0xff] }
  0x8d   :  { %3545 = vmatpush1.bf16.msra.mxu0 %v4353_v43  ;;  %v110_v43 = vlaneseq }
  0x8e   :  { %3546 = vmatprep.subr.bf16.mxu0 %v4362_v46  ;;  %3709 = vmatpush1.bf16.msra.mxu1 %v4355_v47  ;;  %v5107_v46 = vld [vmem:[#allocation5] sm:$0xff] }
  0x8f   :  { %3710 = vmatprep.subr.bf16.mxu1 %v4364_v50  ;;  %v5102_v44 = vshrl.u32 %v110_v43, 7 }
  0x91   :  { %3547 = vmatpush1.bf16.msra.mxu0 %v4361_v51  ;;  %v5105_v45 = vsub.s32 0, %v5102_v44  ;;  %v5110_v47 = vsub.s32 1, %v5102_v44  ;;  %v5113_v48 = vsub.s32 3, %v5102_v44 }
  0x92   :  { %3548 = vmatprep.subr.bf16.mxu0 %v4370_v54  ;;  %3711 = vmatpush1.bf16.msra.mxu1 %v4363_v55 }
  0x93   :  { %3712 = vmatprep.subr.bf16.mxu1 %v4372_v58  ;;  %v113_v49 = vrot.slane %v5107_v46, %v5105_v45  ;;  %v117_v50 = vrot.slane %v5107_v46, %v5110_v47  ;;  %v125_v52 = vrot.slane %v5107_v46, %v5113_v48 }
  0x95   :  { %3549 = vmatpush1.bf16.msra.mxu0 %v4369_v59 }
  0x96   :  { %3550 = vmatprep.subr.bf16.mxu0 %v4378_v62  ;;  %3713 = vmatpush1.bf16.msra.mxu1 %v4371_v63  ;;  %v554_v63 = vld [vmem:[#allocation7 + $0x460] sm:$0xff] }
  0x97   :  { %3714 = vmatprep.subr.bf16.mxu1 %v4380_v2  ;;  %v4426_v8 = vcombine.high %v550_v60, %v554_v63 }
  0x99   :  { %3551 = vmatpush1.bf16.msra.mxu0 %v4377_v3 }
  0x9a   :  { %3552 = vmatprep.subr.bf16.mxu0 %v4386_v6  ;;  %3715 = vmatpush1.bf16.msra.mxu1 %v4379_v7 }
  0x9b   :  { %3716 = vmatprep.subr.bf16.mxu1 %v4388_v10  ;;  %v558_v10 = vld [vmem:[#allocation7 + $0x480] sm:$0xff] }
  0x9d   :  { %3553 = vmatpush1.bf16.msra.mxu0 %v4385_v11  ;;  %v562_v11 = vld [vmem:[#allocation7 + $0x4a0] sm:$0xff] }
  0x9e   :  { %3554 = vmatprep.subr.bf16.mxu0 %v4394_v14  ;;  %3717 = vmatpush1.bf16.msra.mxu1 %v4387_v15  ;;  %v4434_v20 = vcombine.high %v558_v10, %v562_v11  ;;  %v4433_v27 = vcombine.low %v558_v10, %v562_v11  ;;  %v610_v11 = vld [vmem:[#allocation7 + $0x620] sm:$0xff] }
  0x9f   :  { %3718 = vmatprep.subr.bf16.mxu1 %v4396_v16 }
  0xa1   :  { %3555 = vmatpush1.bf16.msra.mxu0 %v4393_v17  ;;  %v4425_v17 = vcombine.low %v550_v60, %v554_v63  ;;  %v602_v63 = vld [vmem:[#allocation7 + $0x5e0] sm:$0xff] }
  0xa2   :  { %3719 = vmatpush1.bf16.msra.mxu1 %v4395_v18  ;;  %3556 = vmatprep.subr.bf16.mxu0 %v4402_v22  ;;  %v4427_v18 = vcombine.low %v551_v0, %v555_v1  ;;  %v566_v22 = vld [vmem:[#allocation7 + $0x4c0] sm:$0xff]  ;;  %v599_v0 = vld [vmem:[#allocation7 + $0x5c8] sm:$0xff] }
  0xa3   :  { %3720 = vmatprep.subr.bf16.mxu1 %v4404_v26  ;;  %v571_v26 = vld [vmem:[#allocation7 + $0x4e8] sm:$0xff] }
  0xa4   :  { %v603_v1 = vld [vmem:[#allocation7 + $0x5e8] sm:$0xff] }
  0xa5   :  { %3557 = vmatpush1.bf16.msra.mxu0 %v4401_v24  ;;  %v570_v24 = vld [vmem:[#allocation7 + $0x4e0] sm:$0xff] }
  0xa6   :  { %3721 = vmatpush1.bf16.msra.mxu1 %v4403_v25  ;;  %3558 = vmatprep.subr.bf16.mxu0 %v4410_v30  ;;  %v567_v25 = vld [vmem:[#allocation7 + $0x4c8] sm:$0xff]  ;;  %v4442_v29 = vcombine.high %v566_v22, %v570_v24  ;;  %v4441_v35 = vcombine.low %v566_v22, %v570_v24  ;;  %v614_v22 = vld [vmem:[#allocation7 + $0x640] sm:$0xff] }
  0xa7   :  { %3722 = vmatprep.subr.bf16.mxu1 %v4412_v34  ;;  %v4444_v30 = vcombine.high %v567_v25, %v571_v26  ;;  %v579_v34 = vld [vmem:[#allocation7 + $0x528] sm:$0xff]  ;;  %v4443_v36 = vcombine.low %v567_v25, %v571_v26 }
  0xa8   :  { %v615_v24 = vld [vmem:[#allocation7 + $0x648] sm:$0xff] }
  0xa9   :  { %3559 = vmatpush1.bf16.msra.mxu0 %v4409_v32  ;;  %v578_v32 = vld [vmem:[#allocation7 + $0x520] sm:$0xff]  ;;  %v619_v25 = vld [vmem:[#allocation7 + $0x668] sm:$0xff] }
  0xaa   :  { %3723 = vmatpush1.bf16.msra.mxu1 %v4411_v33  ;;  %3569 = vmatprep.subr.bf16.mxu0 %v4418_v38  ;;  %v575_v33 = vld [vmem:[#allocation7 + $0x508] sm:$0xff]  ;;  %v4450_v37 = vcombine.high %v574_v31, %v578_v32  ;;  %v4449_v43 = vcombine.low %v574_v31, %v578_v32  ;;  %v626_v31 = vld [vmem:[#allocation7 + $0x6a0] sm:$0xff] }
  0xab   :  { %3733 = vmatprep.subr.bf16.mxu1 %v4420_v42  ;;  %v4452_v38 = vcombine.high %v575_v33, %v579_v34  ;;  %v587_v42 = vld [vmem:[#allocation7 + $0x568] sm:$0xff] }
  0xac   :  { %v623_v32 = vld [vmem:[#allocation7 + $0x688] sm:$0xff] }
 0x137   :  { %v268_v51 = vpop.f32.mrb[0].mxu0  ;;  %v5121_v57 = vpop.f32.mrb[0].mxu1 }
 0x138   :  { %v269_v53 = vadd.f32 %v268_v51, %v113_v49  ;;  %v270_v54 = vpop.f32.mrb[1].mxu0  ;;  %v311_v61 = vpop.f32.mrb[1].mxu1  ;;  %v4451_v49 = vcombine.low %v575_v33, %v579_v34  ;;  %v627_v33 = vld [vmem:[#allocation7 + $0x6a8] sm:$0xff] }
 0x139   :  { %v271_v55 = vadd.f32 %v270_v54, %v117_v50  ;;  %v272_v56 = vpop.f32.mrb[2].mxu0  ;;  %v312_v2 = vadd.f32 %v311_v61, %v125_v52  ;;  %v313_v3 = vpop.f32.mrb[2].mxu1  ;;  %v590_v52 = vld [vmem:[#allocation7 + $0x580] sm:$0xff]  ;;  %v591_v54 = vld [vmem:[#allocation7 + $0x588] sm:$0xff] }
 0x13a   :  { %v398_v58 = vmax.f32 %v269_v53, 0.0  ;;  %v273_v59 = vpop.f32.mrb[3].mxu0  ;;  %v314_v4 = vpop.f32.mrb[3].mxu1  ;;  %v594_v53 = vld [vmem:[#allocation7 + $0x5a0] sm:$0xff] }
 0x13b   :  { %v399_v62 = vmax.f32 %v271_v55, 0.0  ;;  %v401_v6 = vmax.f32 %v312_v2, 0.0  ;;  %v595_v55 = vld [vmem:[#allocation7 + $0x5a8] sm:$0xff]  ;;  %v4466_v59 = vcombine.high %v590_v52, %v594_v53  ;;  %v598_v61 = vld [vmem:[#allocation7 + $0x5c0] sm:$0xff]  ;;  %v4465_v2 = vcombine.low %v590_v52, %v594_v53 }
 0x13c   :  { %v5125_v7 = vpack.c.bf16 %v398_v58, %v398_v58  ;;  %v4468_v60 = vcombine.high %v591_v54, %v595_v55  ;;  %v4467_v3 = vcombine.low %v591_v54, %v595_v55  ;;  %v642_v52 = vld [vmem:[#allocation7 + $0x720] sm:$0xff]  ;;  %v639_v53 = vld [vmem:[#allocation7 + $0x708] sm:$0xff] }
 0x13d   :  { %v5123_v5 = vpack.c.bf16 %v399_v62, %v399_v62  ;;  %v5129_v14 = vpack.c.bf16 %v401_v6, %v401_v6  ;;  %v4474_v6 = vcombine.high %v598_v61, %v602_v63  ;;  %v643_v54 = vld [vmem:[#allocation7 + $0x728] sm:$0xff] }
 0x13f   :  { %3560 = vmatprep.mubr.bf16.mxu0 %v5123_v5  ;;  %3724 = vmatprep.mubr.bf16.mxu1 %v5123_v5  ;;  %v5131_v15 = vpop.f32.mrb[4].mxu0 }
 0x140   :  { %3561 = vmatmul.mubr.bf16.vlgmr.msra.gmra.mrb[8].mxu0 %v5125_v7  ;;  %3725 = vmatmul.mubr.bf16.vlgmr.msra.gmra.mrb[8].mxu1 %v5125_v7  ;;  %v5135_v16 = vpop.f32.mrb[5].mxu0  ;;  %v5139_v62 = vpop.f32.mrb[4].mxu1 }
 0x141   :  { %3570 = vmatpush1.bf16.msra.mxu0 %v4417_v40  ;;  %3734 = vmatpush1.bf16.msra.mxu1 %v4419_v41  ;;  %v354_v19 = vpop.f32.mrb[6].mxu0  ;;  %v586_v40 = vld [vmem:[#allocation7 + $0x560] sm:$0xff]  ;;  %v583_v41 = vld [vmem:[#allocation7 + $0x548] sm:$0xff]  ;;  %v5141_v4 = vpop.f32.mrb[5].mxu1 }
 0x142   :  { %3571 = vmatprep.subr.bf16.mxu0 %v4426_v8  ;;  %3735 = vmatprep.subr.bf16.mxu1 %v4428_v9  ;;  %v355_v23 = vpop.f32.mrb[7].mxu0  ;;  %v4458_v50 = vcombine.high %v582_v39, %v586_v40  ;;  %v4460_v51 = vcombine.high %v583_v41, %v587_v42  ;;  %v4457_v56 = vcombine.low %v582_v39, %v586_v40  ;;  %v606_v9 = vld [vmem:[#allocation7 + $0x600] sm:$0xff]  ;;  %v395_v10 = vpop.f32.mrb[6].mxu1  ;;  %v631_v40 = vld [vmem:[#allocation7 + $0x6c8] sm:$0xff] }
 0x143   :  { %3601 = vmatprep.mubr.bf16.mxu0 %v5129_v14  ;;  %3765 = vmatprep.mubr.bf16.mxu1 %v5129_v14  ;;  %v4459_v58 = vcombine.low %v583_v41, %v587_v42  ;;  %v4476_v8 = vcombine.high %v599_v0, %v603_v1  ;;  %v4475_v19 = vcombine.low %v599_v0, %v603_v1  ;;  %v618_v23 = vld [vmem:[#allocation7 + $0x660] sm:$0xff]  ;;  %v635_v41 = vld [vmem:[#allocation7 + $0x6e8] sm:$0xff]  ;;  %v5144_v1 = vsub.s32 2, %v5102_v44 }
 0x144   :  { %v4481_v26 = vcombine.low %v606_v9, %v610_v11  ;;  %v4489_v34 = vcombine.low %v614_v22, %v618_v23  ;;  %v634_v39 = vld [vmem:[#allocation7 + $0x6e0] sm:$0xff]  ;;  %v651_v0 = vld [vmem:[#allocation7 + $0x768] sm:$0xff] }
 0x145   :  { %3572 = vmatpush1.bf16.msra.mxu0 %v4425_v17  ;;  %3736 = vmatpush1.bf16.msra.mxu1 %v4427_v18  ;;  %v396_v17 = vpop.f32.mrb[7].mxu1  ;;  %v4473_v18 = vcombine.low %v598_v61, %v602_v63  ;;  %v650_v61 = vld [vmem:[#allocation7 + $0x760] sm:$0xff]  ;;  %v647_v63 = vld [vmem:[#allocation7 + $0x748] sm:$0xff] }
 0x146   :  { %3573 = vmatprep.subr.bf16.mxu0 %v4434_v20  ;;  %3737 = vmatprep.subr.bf16.mxu1 %v4436_v21  ;;  %v4482_v20 = vcombine.high %v606_v9, %v610_v11  ;;  %v4484_v21 = vcombine.high %v607_v12, %v611_v13  ;;  %v654_v9 = vld [vmem:[#allocation7 + $0x780] sm:$0xff]  ;;  %v655_v11 = vld [vmem:[#allocation7 + $0x788] sm:$0xff]  ;;  %v121_v17 = vrot.slane %v5107_v46, %v5144_v1 }
 0x147   :  { %v658_v10 = vld [vmem:[#allocation7 + $0x7a0] sm:$0xff] }
 0x149   :  { %3574 = vmatpush1.bf16.msra.mxu0 %v4433_v27  ;;  %3738 = vmatpush1.bf16.msra.mxu1 %v4435_v28  ;;  %v4483_v27 = vcombine.low %v607_v12, %v611_v13  ;;  %v4490_v28 = vcombine.high %v614_v22, %v618_v23  ;;  %v659_v12 = vld [vmem:[#allocation7 + $0x7a8] sm:$0xff]  ;;  %v5147_v13 = vsub.s32 5, %v5102_v44  ;;  %v662_v22 = vld [vmem:[#allocation7 + $0x7c0] sm:$0xff] }
 0x14a   :  { %3575 = vmatprep.subr.bf16.mxu0 %v4442_v29  ;;  %3739 = vmatprep.subr.bf16.mxu1 %v4444_v30  ;;  %v4492_v29 = vcombine.high %v615_v24, %v619_v25  ;;  %v622_v30 = vld [vmem:[#allocation7 + $0x680] sm:$0xff] }
 0x14b   :  { %v4497_v42 = vcombine.low %v622_v30, %v626_v31  ;;  %v666_v23 = vld [vmem:[#allocation7 + $0x7e0] sm:$0xff] }
 0x14d   :  { %3576 = vmatpush1.bf16.msra.mxu0 %v4441_v35  ;;  %3740 = vmatpush1.bf16.msra.mxu1 %v4443_v36  ;;  %v4491_v35 = vcombine.low %v615_v24, %v619_v25  ;;  %v4498_v36 = vcombine.high %v622_v30, %v626_v31  ;;  %v663_v24 = vld [vmem:[#allocation7 + $0x7c8] sm:$0xff]  ;;  %v4538_v30 = vcombine.high %v662_v22, %v666_v23 }
 0x14e   :  { %3577 = vmatprep.subr.bf16.mxu0 %v4450_v37  ;;  %3741 = vmatprep.subr.bf16.mxu1 %v4452_v38  ;;  %v4500_v37 = vcombine.high %v623_v32, %v627_v33  ;;  %v630_v38 = vld [vmem:[#allocation7 + $0x6c0] sm:$0xff]  ;;  %v667_v25 = vld [vmem:[#allocation7 + $0x7e8] sm:$0xff] }
 0x14f   :  { %v4505_v55 = vcombine.low %v630_v38, %v634_v39  ;;  %v4540_v31 = vcombine.high %v663_v24, %v667_v25 }
 0x151   :  { %3578 = vmatpush1.bf16.msra.mxu0 %v4449_v43  ;;  %3742 = vmatpush1.bf16.msra.mxu1 %v4451_v49  ;;  %v4499_v43 = vcombine.low %v623_v32, %v627_v33  ;;  %v4506_v49 = vcombine.high %v630_v38, %v634_v39  ;;  %v670_v32 = vld [vmem:[#allocation7 + $0x800] sm:$0xff]  ;;  %v4537_v38 = vcombine.low %v662_v22, %v666_v23 }
 0x152   :  { %3579 = vmatprep.subr.bf16.mxu0 %v4458_v50  ;;  %3743 = vmatprep.subr.bf16.mxu1 %v4460_v51  ;;  %v4508_v50 = vcombine.high %v631_v40, %v635_v41  ;;  %v638_v51 = vld [vmem:[#allocation7 + $0x700] sm:$0xff]  ;;  %v4539_v39 = vcombine.low %v663_v24, %v667_v25 }
 0x153   :  { %v674_v33 = vld [vmem:[#allocation7 + $0x820] sm:$0xff] }
 0x155   :  { %3580 = vmatpush1.bf16.msra.mxu0 %v4457_v56  ;;  %3744 = vmatpush1.bf16.msra.mxu1 %v4459_v58  ;;  %v4507_v56 = vcombine.low %v631_v40, %v635_v41  ;;  %v4514_v58 = vcombine.high %v638_v51, %v642_v52  ;;  %v678_v41 = vld [vmem:[#allocation7 + $0x840] sm:$0xff] }
 0x156   :  { %3581 = vmatprep.subr.bf16.mxu0 %v4466_v59  ;;  %3745 = vmatprep.subr.bf16.mxu1 %v4468_v60  ;;  %v4516_v59 = vcombine.high %v639_v53, %v643_v54  ;;  %v646_v60 = vld [vmem:[#allocation7 + $0x740] sm:$0xff] }
 0x159   :  { %3582 = vmatpush1.bf16.msra.mxu0 %v4465_v2  ;;  %3746 = vmatpush1.bf16.msra.mxu1 %v4467_v3  ;;  %v4513_v2 = vcombine.low %v638_v51, %v642_v52  ;;  %v4515_v3 = vcombine.low %v639_v53, %v643_v54  ;;  %v4545_v52 = vcombine.low %v670_v32, %v674_v33 }
 0x15a   :  { %3583 = vmatprep.subr.bf16.mxu0 %v4474_v6  ;;  %3747 = vmatprep.subr.bf16.mxu1 %v4476_v8  ;;  %v4522_v6 = vcombine.high %v646_v60, %v650_v61  ;;  %v4524_v8 = vcombine.high %v647_v63, %v651_v0 }
 0x15d   :  { %3584 = vmatpush1.bf16.msra.mxu0 %v4473_v18  ;;  %3748 = vmatpush1.bf16.msra.mxu1 %v4475_v19  ;;  %v4521_v18 = vcombine.low %v646_v60, %v650_v61  ;;  %v4523_v19 = vcombine.low %v647_v63, %v651_v0 }
 0x15e   :  { %3585 = vmatprep.subr.bf16.mxu0 %v4482_v20  ;;  %3749 = vmatprep.subr.bf16.mxu1 %v4484_v21  ;;  %v4530_v20 = vcombine.high %v654_v9, %v658_v10  ;;  %v4532_v21 = vcombine.high %v655_v11, %v659_v12 }
 0x161   :  { %3586 = vmatpush1.bf16.msra.mxu0 %v4481_v26  ;;  %3750 = vmatpush1.bf16.msra.mxu1 %v4483_v27  ;;  %v133_v26 = vrot.slane %v5107_v46, %v5147_v13  ;;  %v310_v27 = vadd.f32 %v5121_v57, %v121_v17  ;;  %v4546_v57 = vcombine.high %v670_v32, %v674_v33 }
 0x162   :  { %3587 = vmatprep.subr.bf16.mxu0 %v4490_v28  ;;  %3751 = vmatprep.subr.bf16.mxu1 %v4492_v29  ;;  %v4529_v28 = vcombine.low %v654_v9, %v658_v10  ;;  %v4531_v29 = vcombine.low %v655_v11, %v659_v12  ;;  %v699_v9 = vld [vmem:[#allocation7 + $0x8e8] sm:$0xff] }
 0x165   :  { %3588 = vmatpush1.bf16.msra.mxu0 %v4489_v34  ;;  %3752 = vmatpush1.bf16.msra.mxu1 %v4491_v35  ;;  %v671_v34 = vld [vmem:[#allocation7 + $0x808] sm:$0xff] }
 0x166   :  { %3589 = vmatprep.subr.bf16.mxu0 %v4498_v36  ;;  %3753 = vmatprep.subr.bf16.mxu1 %v4500_v37  ;;  %v675_v35 = vld [vmem:[#allocation7 + $0x828] sm:$0xff]  ;;  %v353_v36 = vadd.f32 %v5135_v16, %v133_v26  ;;  %v400_v37 = vmax.f32 %v310_v27, 0.0  ;;  %v710_v26 = vld [vmem:[#allocation7 + $0x940] sm:$0xff] }
 0x167   :  { %v4548_v40 = vcombine.high %v671_v34, %v675_v35  ;;  %v4547_v16 = vcombine.low %v671_v34, %v675_v35  ;;  %v714_v27 = vld [vmem:[#allocation7 + $0x960] sm:$0xff] }
 0x168   :  { %v5155_v51 = vpack.c.bf16 %v400_v37, %v400_v37  ;;  %v4586_v32 = vcombine.high %v710_v26, %v714_v27  ;;  %v718_v34 = vld [vmem:[#allocation7 + $0x980] sm:$0xff]  ;;  %v723_v37 = vld [vmem:[#allocation7 + $0x9a8] sm:$0xff] }
 0x169   :  { %3590 = vmatpush1.bf16.msra.mxu0 %v4497_v42  ;;  %3754 = vmatpush1.bf16.msra.mxu1 %v4499_v43  ;;  %v682_v42 = vld [vmem:[#allocation7 + $0x860] sm:$0xff]  ;;  %v679_v43 = vld [vmem:[#allocation7 + $0x848] sm:$0xff] }
 0x16a   :  { %3591 = vmatprep.subr.bf16.mxu0 %v4506_v49  ;;  %3755 = vmatprep.subr.bf16.mxu1 %v4508_v50  ;;  %v683_v49 = vld [vmem:[#allocation7 + $0x868] sm:$0xff]  ;;  %v403_v50 = vmax.f32 %v353_v36, 0.0  ;;  %v4554_v53 = vcombine.high %v678_v41, %v682_v42  ;;  %v4553_v61 = vcombine.low %v678_v41, %v682_v42  ;;  %v722_v35 = vld [vmem:[#allocation7 + $0x9a0] sm:$0xff] }
 0x16b   :  { %v4556_v54 = vcombine.high %v679_v43, %v683_v49  ;;  %v4555_v63 = vcombine.low %v679_v43, %v683_v49  ;;  %v719_v36 = vld [vmem:[#allocation7 + $0x988] sm:$0xff]  ;;  %v726_v41 = vld [vmem:[#allocation7 + $0x9c0] sm:$0xff] }
 0x16c   :  { %v5157_v60 = vpack.c.bf16 %v403_v50, %v403_v50  ;;  %v730_v42 = vld [vmem:[#allocation7 + $0x9e0] sm:$0xff]  ;;  %v727_v43 = vld [vmem:[#allocation7 + $0x9c8] sm:$0xff]  ;;  %v4593_v50 = vcombine.low %v718_v34, %v722_v35 }
 0x16d   :  { %3592 = vmatpush1.bf16.msra.mxu0 %v4505_v55  ;;  %3756 = vmatpush1.bf16.msra.mxu1 %v4507_v56  ;;  %v686_v55 = vld [vmem:[#allocation7 + $0x880] sm:$0xff]  ;;  %v731_v49 = vld [vmem:[#allocation7 + $0x9e8] sm:$0xff] }
 0x16e   :  { %3593 = vmatprep.subr.bf16.mxu0 %v4514_v58  ;;  %3757 = vmatprep.subr.bf16.mxu1 %v4516_v59  ;;  %v690_v56 = vld [vmem:[#allocation7 + $0x8a0] sm:$0xff]  ;;  %v687_v58 = vld [vmem:[#allocation7 + $0x888] sm:$0xff] }
 0x16f   :  { %v691_v59 = vld [vmem:[#allocation7 + $0x8a8] sm:$0xff]  ;;  %v4562_v0 = vcombine.high %v686_v55, %v690_v56  ;;  %v4561_v10 = vcombine.low %v686_v55, %v690_v56  ;;  %v738_v55 = vld [vmem:[#allocation7 + $0xa20] sm:$0xff] }
 0x170   :  { %v4563_v11 = vcombine.low %v687_v58, %v691_v59  ;;  %v735_v56 = vld [vmem:[#allocation7 + $0xa08] sm:$0xff] }
 0x171   :  { %3594 = vmatpush1.bf16.msra.mxu0 %v4513_v2  ;;  %3758 = vmatpush1.bf16.msra.mxu1 %v4515_v3  ;;  %v4564_v2 = vcombine.high %v687_v58, %v691_v59  ;;  %v694_v3 = vld [vmem:[#allocation7 + $0x8c0] sm:$0xff]  ;;  %v739_v58 = vld [vmem:[#allocation7 + $0xa28] sm:$0xff]  ;;  %v4601_v59 = vcombine.low %v726_v41, %v730_v42 }
 0x172   :  { %3595 = vmatprep.subr.bf16.mxu0 %v4522_v6  ;;  %3759 = vmatprep.subr.bf16.mxu1 %v4524_v8  ;;  %v698_v6 = vld [vmem:[#allocation7 + $0x8e0] sm:$0xff]  ;;  %v695_v8 = vld [vmem:[#allocation7 + $0x8c8] sm:$0xff] }
 0x173   :  { %v4570_v12 = vcombine.high %v694_v3, %v698_v6  ;;  %v4572_v17 = vcombine.high %v695_v8, %v699_v9  ;;  %v4569_v22 = vcombine.low %v694_v3, %v698_v6  ;;  %v4571_v23 = vcombine.low %v695_v8, %v699_v9  ;;  %v746_v3 = vld [vmem:[#allocation7 + $0xa60] sm:$0xff]  ;;  %v743_v6 = vld [vmem:[#allocation7 + $0xa48] sm:$0xff] }
 0x174   :  { %v747_v8 = vld [vmem:[#allocation7 + $0xa68] sm:$0xff] }
 0x175   :  { %3596 = vmatpush1.bf16.msra.mxu0 %v4521_v18  ;;  %3760 = vmatpush1.bf16.msra.mxu1 %v4523_v19  ;;  %v702_v18 = vld [vmem:[#allocation7 + $0x900] sm:$0xff] }
 0x176   :  { %3597 = vmatprep.subr.bf16.mxu0 %v4530_v20  ;;  %3761 = vmatprep.subr.bf16.mxu1 %v4532_v21  ;;  %v706_v19 = vld [vmem:[#allocation7 + $0x920] sm:$0xff]  ;;  %v703_v20 = vld [vmem:[#allocation7 + $0x908] sm:$0xff] }
 0x177   :  { %v707_v21 = vld [vmem:[#allocation7 + $0x928] sm:$0xff]  ;;  %v4578_v24 = vcombine.high %v702_v18, %v706_v19 }
 0x178   :  { %v4580_v25 = vcombine.high %v703_v20, %v707_v21 }
 0x179   :  { %3598 = vmatpush1.bf16.msra.mxu0 %v4529_v28  ;;  %3762 = vmatpush1.bf16.msra.mxu1 %v4531_v29  ;;  %v711_v28 = vld [vmem:[#allocation7 + $0x948] sm:$0xff] }
 0x17a   :  { %3599 = vmatprep.subr.bf16.mxu0 %v4538_v30  ;;  %3763 = vmatprep.subr.bf16.mxu1 %v4540_v31  ;;  %v715_v29 = vld [vmem:[#allocation7 + $0x968] sm:$0xff]  ;;  %v4577_v30 = vcombine.low %v702_v18, %v706_v19  ;;  %v4579_v31 = vcombine.low %v703_v20, %v707_v21  ;;  %v754_v18 = vld [vmem:[#allocation7 + $0xaa0] sm:$0xff] }
 0x17b   :  { %v4588_v33 = vcombine.high %v711_v28, %v715_v29  ;;  %v751_v19 = vld [vmem:[#allocation7 + $0xa88] sm:$0xff] }
 0x17c   :  { %v755_v20 = vld [vmem:[#allocation7 + $0xaa8] sm:$0xff] }
 0x17d   :  { %3600 = vmatpush1.bf16.msra.mxu0 %v4537_v38  ;;  %3764 = vmatpush1.bf16.msra.mxu1 %v4539_v39  ;;  %v4585_v38 = vcombine.low %v710_v26, %v714_v27  ;;  %v4587_v39 = vcombine.low %v711_v28, %v715_v29  ;;  %v762_v26 = vld [vmem:[#allocation7 + $0xae0] sm:$0xff]  ;;  %v759_v27 = vld [vmem:[#allocation7 + $0xac8] sm:$0xff] }
 0x17e   :  { %3610 = vmatprep.subr.bf16.mxu0 %v4546_v57  ;;  %3774 = vmatprep.subr.bf16.mxu1 %v4548_v40  ;;  %v4594_v57 = vcombine.high %v718_v34, %v722_v35  ;;  %v4596_v40 = vcombine.high %v719_v36, %v723_v37  ;;  %v763_v28 = vld [vmem:[#allocation7 + $0xae8] sm:$0xff]  ;;  %v770_v34 = vld [vmem:[#allocation7 + $0xb20] sm:$0xff] }
 0x17f   :  { %v767_v35 = vld [vmem:[#allocation7 + $0xb08] sm:$0xff] }
 0x180   :  { %3602 = vmatmul.mubr.bf16.vlgmr.msra.gmra.mrb[8].mxu0 %v5155_v51  ;;  %3766 = vmatmul.mubr.bf16.vlgmr.msra.gmra.mrb[8].mxu1 %v5155_v51 }
 0x181   :  { %3611 = vmatpush1.bf16.msra.mxu0 %v4545_v52  ;;  %3775 = vmatpush1.bf16.msra.mxu1 %v4547_v16  ;;  %v4595_v52 = vcombine.low %v719_v36, %v723_v37  ;;  %v4602_v16 = vcombine.high %v726_v41, %v730_v42  ;;  %v771_v36 = vld [vmem:[#allocation7 + $0xb28] sm:$0xff]  ;;  %v778_v41 = vld [vmem:[#allocation7 + $0xb60] sm:$0xff] }
 0x182   :  { %3612 = vmatprep.subr.bf16.mxu0 %v4554_v53  ;;  %3776 = vmatprep.subr.bf16.mxu1 %v4556_v54  ;;  %v4604_v53 = vcombine.high %v727_v43, %v731_v49  ;;  %v734_v54 = vld [vmem:[#allocation7 + $0xa00] sm:$0xff]  ;;  %v775_v42 = vld [vmem:[#allocation7 + $0xb48] sm:$0xff] }
 0x183   :  { %3642 = vmatprep.mubr.bf16.mxu0 %v5157_v60  ;;  %3806 = vmatprep.mubr.bf16.mxu1 %v5157_v60  ;;  %v4609_v9 = vcombine.low %v734_v54, %v738_v55 }
 0x185   :  { %3613 = vmatpush1.bf16.msra.mxu0 %v4553_v61  ;;  %3777 = vmatpush1.bf16.msra.mxu1 %v4555_v63  ;;  %v4603_v61 = vcombine.low %v727_v43, %v731_v49  ;;  %v4610_v63 = vcombine.high %v734_v54, %v738_v55  ;;  %v779_v43 = vld [vmem:[#allocation7 + $0xb68] sm:$0xff]  ;;  %v5164_v49 = vsub.s32 4, %v5102_v44  ;;  %v782_v54 = vld [vmem:[#allocation7 + $0xb80] sm:$0xff] }
 0x186   :  { %3614 = vmatprep.subr.bf16.mxu0 %v4562_v0  ;;  %3778 = vmatprep.subr.bf16.mxu1 %v4564_v2  ;;  %v4612_v0 = vcombine.high %v735_v56, %v739_v58  ;;  %v742_v2 = vld [vmem:[#allocation7 + $0xa40] sm:$0xff] }
 0x187   :  { %v4617_v21 = vcombine.low %v742_v2, %v746_v3  ;;  %v786_v55 = vld [vmem:[#allocation7 + $0xba0] sm:$0xff] }
 0x189   :  { %3615 = vmatpush1.bf16.msra.mxu0 %v4561_v10  ;;  %3779 = vmatpush1.bf16.msra.mxu1 %v4563_v11  ;;  %v4611_v10 = vcombine.low %v735_v56, %v739_v58  ;;  %v4618_v11 = vcombine.high %v742_v2, %v746_v3  ;;  %v783_v56 = vld [vmem:[#allocation7 + $0xb88] sm:$0xff]  ;;  %v4658_v2 = vcombine.high %v782_v54, %v786_v55 }
 0x18a   :  { %3616 = vmatprep.subr.bf16.mxu0 %v4570_v12  ;;  %3780 = vmatprep.subr.bf16.mxu1 %v4572_v17  ;;  %v4620_v12 = vcombine.high %v743_v6, %v747_v8  ;;  %v750_v17 = vld [vmem:[#allocation7 + $0xa80] sm:$0xff]  ;;  %v787_v58 = vld [vmem:[#allocation7 + $0xba8] sm:$0xff] }
 0x18b   :  { %v4625_v29 = vcombine.low %v750_v17, %v754_v18  ;;  %v4660_v3 = vcombine.high %v783_v56, %v787_v58 }
 0x18d   :  { %3617 = vmatpush1.bf16.msra.mxu0 %v4569_v22  ;;  %3781 = vmatpush1.bf16.msra.mxu1 %v4571_v23  ;;  %v4619_v22 = vcombine.low %v743_v6, %v747_v8  ;;  %v4626_v23 = vcombine.high %v750_v17, %v754_v18  ;;  %v790_v6 = vld [vmem:[#allocation7 + $0xbc0] sm:$0xff]  ;;  %v4657_v17 = vcombine.low %v782_v54, %v786_v55  ;;  %v823_v54 = vld [vmem:[#allocation7 + $0xcc8] sm:$0xff] }
 0x18e   :  { %3618 = vmatprep.subr.bf16.mxu0 %v4578_v24  ;;  %3782 = vmatprep.subr.bf16.mxu1 %v4580_v25  ;;  %v4628_v24 = vcombine.high %v751_v19, %v755_v20  ;;  %v758_v25 = vld [vmem:[#allocation7 + $0xac0] sm:$0xff]  ;;  %v4659_v18 = vcombine.low %v783_v56, %v787_v58  ;;  %v827_v55 = vld [vmem:[#allocation7 + $0xce8] sm:$0xff] }
 0x18f   :  { %v4633_v37 = vcombine.low %v758_v25, %v762_v26  ;;  %v794_v8 = vld [vmem:[#allocation7 + $0xbe0] sm:$0xff] }
 0x191   :  { %3619 = vmatpush1.bf16.msra.mxu0 %v4577_v30  ;;  %3783 = vmatpush1.bf16.msra.mxu1 %v4579_v31  ;;  %v4627_v30 = vcombine.low %v751_v19, %v755_v20  ;;  %v4634_v31 = vcombine.high %v758_v25, %v762_v26  ;;  %v4666_v19 = vcombine.high %v790_v6, %v794_v8 }
 0x192   :  { %3620 = vmatprep.subr.bf16.mxu0 %v4586_v32  ;;  %3784 = vmatprep.subr.bf16.mxu1 %v4588_v33  ;;  %v4636_v32 = vcombine.high %v759_v27, %v763_v28  ;;  %v766_v33 = vld [vmem:[#allocation7 + $0xb00] sm:$0xff] }
 0x195   :  { %3621 = vmatpush1.bf16.msra.mxu0 %v4585_v38  ;;  %3785 = vmatpush1.bf16.msra.mxu1 %v4587_v39  ;;  %v4635_v38 = vcombine.low %v759_v27, %v763_v28  ;;  %v4642_v39 = vcombine.high %v766_v33, %v770_v34 }
 0x196   :  { %3622 = vmatprep.subr.bf16.mxu0 %v4594_v57  ;;  %3786 = vmatprep.subr.bf16.mxu1 %v4596_v40  ;;  %v4644_v57 = vcombine.high %v767_v35, %v771_v36  ;;  %v774_v40 = vld [vmem:[#allocation7 + $0xb40] sm:$0xff] }
 0x199   :  { %3623 = vmatpush1.bf16.msra.mxu0 %v4593_v50  ;;  %3787 = vmatpush1.bf16.msra.mxu1 %v4595_v52  ;;  %v4641_v50 = vcombine.low %v766_v33, %v770_v34  ;;  %v4643_v52 = vcombine.low %v767_v35, %v771_v36 }
 0x19a   :  { %3624 = vmatprep.subr.bf16.mxu0 %v4602_v16  ;;  %3788 = vmatprep.subr.bf16.mxu1 %v4604_v53  ;;  %v4650_v16 = vcombine.high %v774_v40, %v778_v41  ;;  %v4652_v53 = vcombine.high %v775_v42, %v779_v43 }
 0x19d   :  { %3625 = vmatpush1.bf16.msra.mxu0 %v4601_v59  ;;  %3789 = vmatpush1.bf16.msra.mxu1 %v4603_v61  ;;  %v5167_v59 = vsub.s32 7, %v5102_v44  ;;  %v129_v61 = vrot.slane %v5107_v46, %v5164_v49 }
 0x19e   :  { %3626 = vmatprep.subr.bf16.mxu0 %v4610_v63  ;;  %3790 = vmatprep.subr.bf16.mxu1 %v4612_v0  ;;  %v4649_v63 = vcombine.low %v774_v40, %v778_v41  ;;  %v4651_v0 = vcombine.low %v775_v42, %v779_v43  ;;  %v819_v40 = vld [vmem:[#allocation7 + $0xca8] sm:$0xff] }
 0x1a1   :  { %3627 = vmatpush1.bf16.msra.mxu0 %v4609_v9  ;;  %3791 = vmatpush1.bf16.msra.mxu1 %v4611_v10  ;;  %v791_v9 = vld [vmem:[#allocation7 + $0xbc8] sm:$0xff] }
 0x1a2   :  { %3628 = vmatprep.subr.bf16.mxu0 %v4618_v11  ;;  %3792 = vmatprep.subr.bf16.mxu1 %v4620_v12  ;;  %v795_v10 = vld [vmem:[#allocation7 + $0xbe8] sm:$0xff]  ;;  %v141_v11 = vrot.slane %v5107_v46, %v5167_v59  ;;  %v351_v12 = vadd.f32 %v5131_v15, %v129_v61  ;;  %v4665_v46 = vcombine.low %v790_v6, %v794_v8 }
 0x1a3   :  { %v4668_v20 = vcombine.high %v791_v9, %v795_v10  ;;  %v4667_v27 = vcombine.low %v791_v9, %v795_v10  ;;  %v835_v6 = vld [vmem:[#allocation7 + $0xd28] sm:$0xff]  ;;  %v4699_v9 = vcombine.low %v823_v54, %v827_v55 }
 0x1a4   :  { %v394_v25 = vadd.f32 %v5141_v4, %v141_v11  ;;  %v402_v26 = vmax.f32 %v351_v12, 0.0  ;;  %v838_v12 = vld [vmem:[#allocation7 + $0xd40] sm:$0xff] }
 0x1a5   :  { %3629 = vmatpush1.bf16.msra.mxu0 %v4617_v21  ;;  %3793 = vmatpush1.bf16.msra.mxu1 %v4619_v22  ;;  %v798_v21 = vld [vmem:[#allocation7 + $0xc00] sm:$0xff] }
 0x1a6   :  { %3630 = vmatprep.subr.bf16.mxu0 %v4626_v23  ;;  %3794 = vmatprep.subr.bf16.mxu1 %v4628_v24  ;;  %v802_v22 = vld [vmem:[#allocation7 + $0xc20] sm:$0xff]  ;;  %v799_v23 = vld [vmem:[#allocation7 + $0xc08] sm:$0xff]  ;;  %v405_v33 = vmax.f32 %v394_v25, 0.0  ;;  %v5175_v34 = vpack.c.bf16 %v402_v26, %v402_v26 }
 0x1a7   :  { %v803_v24 = vld [vmem:[#allocation7 + $0xc28] sm:$0xff]  ;;  %v4674_v15 = vcombine.high %v798_v21, %v802_v22  ;;  %v4673_v35 = vcombine.low %v798_v21, %v802_v22  ;;  %v850_v25 = vld [vmem:[#allocation7 + $0xda0] sm:$0xff] }
 0x1a8   :  { %v4676_v28 = vcombine.high %v799_v23, %v803_v24  ;;  %v4675_v4 = vcombine.low %v799_v23, %v803_v24  ;;  %v5177_v41 = vpack.c.bf16 %v405_v33, %v405_v33  ;;  %v846_v24 = vld [vmem:[#allocation7 + $0xd80] sm:$0xff]  ;;  %v847_v26 = vld [vmem:[#allocation7 + $0xd88] sm:$0xff] }
 0x1a9   :  { %3631 = vmatpush1.bf16.msra.mxu0 %v4625_v29  ;;  %3795 = vmatpush1.bf16.msra.mxu1 %v4627_v30  ;;  %v806_v29 = vld [vmem:[#allocation7 + $0xc40] sm:$0xff]  ;;  %v859_v33 = vld [vmem:[#allocation7 + $0xde8] sm:$0xff] }
 0x1aa   :  { %3632 = vmatprep.subr.bf16.mxu0 %v4634_v31  ;;  %3796 = vmatprep.subr.bf16.mxu1 %v4636_v32  ;;  %v810_v30 = vld [vmem:[#allocation7 + $0xc60] sm:$0xff]  ;;  %v807_v31 = vld [vmem:[#allocation7 + $0xc48] sm:$0xff] }
 0x1ab   :  { %v811_v32 = vld [vmem:[#allocation7 + $0xc68] sm:$0xff]  ;;  %v4682_v36 = vcombine.high %v806_v29, %v810_v30  ;;  %v4681_v42 = vcombine.low %v806_v29, %v810_v30  ;;  %v854_v30 = vld [vmem:[#allocation7 + $0xdc0] sm:$0xff] }
 0x1ac   :  { %v4683_v43 = vcombine.low %v807_v31, %v811_v32 }
 0x1ad   :  { %3633 = vmatpush1.bf16.msra.mxu0 %v4633_v37  ;;  %3797 = vmatpush1.bf16.msra.mxu1 %v4635_v38  ;;  %v4684_v37 = vcombine.high %v807_v31, %v811_v32  ;;  %v814_v38 = vld [vmem:[#allocation7 + $0xc80] sm:$0xff]  ;;  %v855_v32 = vld [vmem:[#allocation7 + $0xdc8] sm:$0xff] }
 0x1ae   :  { %3634 = vmatprep.subr.bf16.mxu0 %v4642_v39  ;;  %3798 = vmatprep.subr.bf16.mxu1 %v4644_v57  ;;  %v818_v39 = vld [vmem:[#allocation7 + $0xca0] sm:$0xff]  ;;  %v815_v57 = vld [vmem:[#allocation7 + $0xc88] sm:$0xff] }
 0x1af   :  { %v4689_v56 = vcombine.low %v814_v38, %v818_v39  ;;  %v4691_v58 = vcombine.low %v815_v57, %v819_v40  ;;  %v858_v31 = vld [vmem:[#allocation7 + $0xde0] sm:$0xff] }
 0x1b1   :  { %3635 = vmatpush1.bf16.msra.mxu0 %v4641_v50  ;;  %3799 = vmatpush1.bf16.msra.mxu1 %v4643_v52  ;;  %v4690_v50 = vcombine.high %v814_v38, %v818_v39  ;;  %v4692_v52 = vcombine.high %v815_v57, %v819_v40  ;;  %v862_v38 = vld [vmem:[#allocation7 + $0xe00] sm:$0xff]  ;;  %v863_v57 = vld [vmem:[#allocation7 + $0xe08] sm:$0xff] }
 0x1b2   :  { %3636 = vmatprep.subr.bf16.mxu0 %v4650_v16  ;;  %3800 = vmatprep.subr.bf16.mxu1 %v4652_v53  ;;  %v822_v16 = vld [vmem:[#allocation7 + $0xcc0] sm:$0xff]  ;;  %v867_v40 = vld [vmem:[#allocation7 + $0xe28] sm:$0xff] }
 0x1b3   :  { %v826_v53 = vld [vmem:[#allocation7 + $0xce0] sm:$0xff] }
 0x1b4   :  { %v4698_v61 = vcombine.high %v822_v16, %v826_v53  ;;  %v4697_v8 = vcombine.low %v822_v16, %v826_v53  ;;  %v866_v39 = vld [vmem:[#allocation7 + $0xe20] sm:$0xff] }
 0x1b5   :  { %3637 = vmatpush1.bf16.msra.mxu0 %v4649_v63  ;;  %3801 = vmatpush1.bf16.msra.mxu1 %v4651_v0  ;;  %v4700_v63 = vcombine.high %v823_v54, %v827_v55  ;;  %v830_v0 = vld [vmem:[#allocation7 + $0xd00] sm:$0xff]  ;;  %v871_v54 = vld [vmem:[#allocation7 + $0xe48] sm:$0xff] }
 0x1b6   :  { %3638 = vmatprep.subr.bf16.mxu0 %v4658_v2  ;;  %3802 = vmatprep.subr.bf16.mxu1 %v4660_v3  ;;  %v834_v2 = vld [vmem:[#allocation7 + $0xd20] sm:$0xff]  ;;  %v831_v3 = vld [vmem:[#allocation7 + $0xd08] sm:$0xff] }
 0x1b7   :  { %v4706_v10 = vcombine.high %v830_v0, %v834_v2  ;;  %v4708_v11 = vcombine.high %v831_v3, %v835_v6  ;;  %v4707_v21 = vcombine.low %v831_v3, %v835_v6  ;;  %v870_v16 = vld [vmem:[#allocation7 + $0xe40] sm:$0xff]  ;;  %v875_v55 = vld [vmem:[#allocation7 + $0xe68] sm:$0xff] }
 0x1b8   :  { %v874_v53 = vld [vmem:[#allocation7 + $0xe60] sm:$0xff]  ;;  %v879_v3 = vld [vmem:[#allocation7 + $0xe88] sm:$0xff] }
 0x1b9   :  { %3639 = vmatpush1.bf16.msra.mxu0 %v4657_v17  ;;  %3803 = vmatpush1.bf16.msra.mxu1 %v4659_v18  ;;  %v842_v17 = vld [vmem:[#allocation7 + $0xd60] sm:$0xff]  ;;  %v839_v18 = vld [vmem:[#allocation7 + $0xd48] sm:$0xff] }
 0x1ba   :  { %3640 = vmatprep.subr.bf16.mxu0 %v4666_v19  ;;  %3804 = vmatprep.subr.bf16.mxu1 %v4668_v20  ;;  %v843_v19 = vld [vmem:[#allocation7 + $0xd68] sm:$0xff]  ;;  %v4705_v20 = vcombine.low %v830_v0, %v834_v2  ;;  %v4714_v22 = vcombine.high %v838_v12, %v842_v17  ;;  %v878_v0 = vld [vmem:[#allocation7 + $0xe80] sm:$0xff] }
 0x1bb   :  { %v4716_v23 = vcombine.high %v839_v18, %v843_v19  ;;  %v882_v2 = vld [vmem:[#allocation7 + $0xea0] sm:$0xff]  ;;  %v883_v6 = vld [vmem:[#allocation7 + $0xea8] sm:$0xff] }
 0x1bd   :  { %3641 = vmatpush1.bf16.msra.mxu0 %v4665_v46  ;;  %3805 = vmatpush1.bf16.msra.mxu1 %v4667_v27  ;;  %v851_v46 = vld [vmem:[#allocation7 + $0xda8] sm:$0xff]  ;;  %v4713_v27 = vcombine.low %v838_v12, %v842_v17  ;;  %v886_v12 = vld [vmem:[#allocation7 + $0xec0] sm:$0xff] }
 0x1be   :  { %3651 = vmatprep.subr.bf16.mxu0 %v4674_v15  ;;  %3815 = vmatprep.subr.bf16.mxu1 %v4676_v28  ;;  %v4715_v15 = vcombine.low %v839_v18, %v843_v19  ;;  %v4722_v28 = vcombine.high %v846_v24, %v850_v25  ;;  %v4724_v29 = vcombine.high %v847_v26, %v851_v46  ;;  %v890_v17 = vld [vmem:[#allocation7 + $0xee0] sm:$0xff]  ;;  %v887_v18 = vld [vmem:[#allocation7 + $0xec8] sm:$0xff] }
 0x1bf   :  { %v891_v19 = vld [vmem:[#allocation7 + $0xee8] sm:$0xff] }
 0x1c0   :  { %3643 = vmatmul.mubr.bf16.vlgmr.msra.gmra.mrb[8].mxu0 %v5175_v34  ;;  %3807 = vmatmul.mubr.bf16.vlgmr.msra.gmra.mrb[8].mxu1 %v5175_v34 }
 0x1c1   :  { %3652 = vmatpush1.bf16.msra.mxu0 %v4673_v35  ;;  %3816 = vmatpush1.bf16.msra.mxu1 %v4675_v4  ;;  %v4721_v35 = vcombine.low %v846_v24, %v850_v25  ;;  %v4723_v4 = vcombine.low %v847_v26, %v851_v46  ;;  %v894_v24 = vld [vmem:[#allocation7 + $0xf00] sm:$0xff]  ;;  %v895_v26 = vld [vmem:[#allocation7 + $0xf08] sm:$0xff] }
 0x1c2   :  { %3653 = vmatprep.subr.bf16.mxu0 %v4682_v36  ;;  %3817 = vmatprep.subr.bf16.mxu1 %v4684_v37  ;;  %v4730_v36 = vcombine.high %v854_v30, %v858_v31  ;;  %v4732_v37 = vcombine.high %v855_v32, %v859_v33  ;;  %v898_v25 = vld [vmem:[#allocation7 + $0xf20] sm:$0xff]  ;;  %v899_v46 = vld [vmem:[#allocation7 + $0xf28] sm:$0xff] }
 0x1c3   :  { %3683 = vmatprep.mubr.bf16.mxu0 %v5177_v41  ;;  %3847 = vmatprep.mubr.bf16.mxu1 %v5177_v41 }
 0x1c5   :  { %3654 = vmatpush1.bf16.msra.mxu0 %v4681_v42  ;;  %3818 = vmatpush1.bf16.msra.mxu1 %v4683_v43  ;;  %v4729_v42 = vcombine.low %v854_v30, %v858_v31  ;;  %v4731_v43 = vcombine.low %v855_v32, %v859_v33  ;;  %v902_v30 = vld [vmem:[#allocation7 + $0xf40] sm:$0xff]  ;;  %v903_v32 = vld [vmem:[#allocation7 + $0xf48] sm:$0xff] }
 0x1c6   :  { %3655 = vmatprep.subr.bf16.mxu0 %v4690_v50  ;;  %3819 = vmatprep.subr.bf16.mxu1 %v4692_v52  ;;  %v4738_v50 = vcombine.high %v862_v38, %v866_v39  ;;  %v4740_v52 = vcombine.high %v863_v57, %v867_v40  ;;  %v906_v31 = vld [vmem:[#allocation7 + $0xf60] sm:$0xff]  ;;  %v907_v33 = vld [vmem:[#allocation7 + $0xf68] sm:$0xff] }
 0x1c9   :  { %3656 = vmatpush1.bf16.msra.mxu0 %v4689_v56  ;;  %3820 = vmatpush1.bf16.msra.mxu1 %v4691_v58  ;;  %v4737_v56 = vcombine.low %v862_v38, %v866_v39  ;;  %v4739_v58 = vcombine.low %v863_v57, %v867_v40  ;;  %v4780_v38 = vcombine.high %v903_v32, %v907_v33  ;;  %v910_v39 = vld [vmem:[#allocation7 + $0xf80] sm:$0xff]  ;;  %v911_v40 = vld [vmem:[#allocation7 + $0xf88] sm:$0xff] }
 0x1ca   :  { %3657 = vmatprep.subr.bf16.mxu0 %v4698_v61  ;;  %3821 = vmatprep.subr.bf16.mxu1 %v4700_v63  ;;  %v4746_v61 = vcombine.high %v870_v16, %v874_v53  ;;  %v4748_v63 = vcombine.high %v871_v54, %v875_v55  ;;  %v914_v57 = vld [vmem:[#allocation7 + $0xfa0] sm:$0xff] }
 0x1cd   :  { %3658 = vmatpush1.bf16.msra.mxu0 %v4697_v8  ;;  %3822 = vmatpush1.bf16.msra.mxu1 %v4699_v9  ;;  %v4745_v8 = vcombine.low %v870_v16, %v874_v53  ;;  %v4747_v9 = vcombine.low %v871_v54, %v875_v55  ;;  %v4786_v53 = vcombine.high %v910_v39, %v914_v57  ;;  %v918_v54 = vld [vmem:[#allocation7 + $0xfc0] sm:$0xff] }
 0x1ce   :  { %3659 = vmatprep.subr.bf16.mxu0 %v4706_v10  ;;  %3823 = vmatprep.subr.bf16.mxu1 %v4708_v11  ;;  %v4754_v10 = vcombine.high %v878_v0, %v882_v2  ;;  %v4756_v11 = vcombine.high %v879_v3, %v883_v6  ;;  %v922_v55 = vld [vmem:[#allocation7 + $0xfe0] sm:$0xff] }
 0x1d1   :  { %3660 = vmatpush1.bf16.msra.mxu0 %v4705_v20  ;;  %3824 = vmatpush1.bf16.msra.mxu1 %v4707_v21  ;;  %v4753_v20 = vcombine.low %v878_v0, %v882_v2  ;;  %v4755_v21 = vcombine.low %v879_v3, %v883_v6  ;;  %v4794_v2 = vcombine.high %v918_v54, %v922_v55  ;;  %v416_v6 = vld [vmem:[#allocation7 + $0x10] sm:$0xff] }
 0x1d2   :  { %3661 = vmatprep.subr.bf16.mxu0 %v4714_v22  ;;  %3825 = vmatprep.subr.bf16.mxu1 %v4716_v23  ;;  %v4762_v22 = vcombine.high %v886_v12, %v890_v17  ;;  %v4764_v23 = vcombine.high %v887_v18, %v891_v19 }
 0x1d5   :  { %3662 = vmatpush1.bf16.msra.mxu0 %v4713_v27  ;;  %3826 = vmatpush1.bf16.msra.mxu1 %v4715_v15  ;;  %v4761_v27 = vcombine.low %v886_v12, %v890_v17  ;;  %v4763_v15 = vcombine.low %v887_v18, %v891_v19 }
 0x1d6   :  { %3663 = vmatprep.subr.bf16.mxu0 %v4722_v28  ;;  %3827 = vmatprep.subr.bf16.mxu1 %v4724_v29  ;;  %v4770_v28 = vcombine.high %v894_v24, %v898_v25  ;;  %v4772_v29 = vcombine.high %v895_v26, %v899_v46 }
 0x1d9   :  { %3664 = vmatpush1.bf16.msra.mxu0 %v4721_v35  ;;  %3828 = vmatpush1.bf16.msra.mxu1 %v4723_v4  ;;  %v4769_v35 = vcombine.low %v894_v24, %v898_v25  ;;  %v4771_v4 = vcombine.low %v895_v26, %v899_v46 }
 0x1da   :  { %3665 = vmatprep.subr.bf16.mxu0 %v4730_v36  ;;  %3829 = vmatprep.subr.bf16.mxu1 %v4732_v37  ;;  %v5184_v36 = vsub.s32 6, %v5102_v44  ;;  %v4778_v37 = vcombine.high %v902_v30, %v906_v31 }
 0x1dd   :  { %3666 = vmatpush1.bf16.msra.mxu0 %v4729_v42  ;;  %3830 = vmatpush1.bf16.msra.mxu1 %v4731_v43  ;;  %v915_v42 = vld [vmem:[#allocation7 + $0xfa8] sm:$0xff]  ;;  %v4777_v43 = vcombine.low %v902_v30, %v906_v31 }
 0x1de   :  { %3667 = vmatprep.subr.bf16.mxu0 %v4738_v50  ;;  %3831 = vmatprep.subr.bf16.mxu1 %v4740_v52  ;;  %v4779_v50 = vcombine.low %v903_v32, %v907_v33  ;;  %v4870_v52 = vld [vmem:[#allocation5] sm:$0xff]  ;;  %v4788_v44 = vcombine.high %v911_v40, %v915_v42 }
 0x1df   :  { %v137_v16 = vrot.slane %v4870_v52, %v5184_v36  ;;  %v453_v52 = vld [vmem:[#allocation7 + $0x138] sm:$0xff] }
 0x1e1   :  { %3668 = vmatpush1.bf16.msra.mxu0 %v4737_v56  ;;  %3832 = vmatpush1.bf16.msra.mxu1 %v4739_v58  ;;  %v919_v56 = vld [vmem:[#allocation7 + $0xfc8] sm:$0xff]  ;;  %v392_v0 = vadd.f32 %v5139_v62, %v137_v16  ;;  %v425_v62 = vld [vmem:[#allocation7 + $0x58] sm:$0xff] }
 0x1e2   :  { %3669 = vmatprep.subr.bf16.mxu0 %v4746_v61  ;;  %3833 = vmatprep.subr.bf16.mxu1 %v4748_v63  ;;  %v923_v58 = vld [vmem:[#allocation7 + $0xfe8] sm:$0xff]  ;;  %v4785_v61 = vcombine.low %v910_v39, %v914_v57  ;;  %v4787_v63 = vcombine.low %v911_v40, %v915_v42 }
 0x1e3   :  { %v4796_v3 = vcombine.high %v919_v56, %v923_v58  ;;  %v4795_v12 = vcombine.low %v919_v56, %v923_v58  ;;  %v404_v17 = vmax.f32 %v392_v0, 0.0  ;;  %v460_v56 = vld [vmem:[#allocation7 + $0x170] sm:$0xff]  ;;  %v457_v58 = vld [vmem:[#allocation7 + $0x158] sm:$0xff] }
 0x1e5   :  { %3670 = vmatpush1.bf16.msra.mxu0 %v4745_v8  ;;  %3834 = vmatpush1.bf16.msra.mxu1 %v4747_v9  ;;  %v420_v8 = vld [vmem:[#allocation7 + $0x30] sm:$0xff]  ;;  %v417_v9 = vld [vmem:[#allocation7 + $0x18] sm:$0xff]  ;;  %v5188_v24 = vpack.c.bf16 %v404_v17, %v404_v17 }
 0x1e6   :  { %3671 = vmatprep.subr.bf16.mxu0 %v4754_v10  ;;  %3835 = vmatprep.subr.bf16.mxu1 %v4756_v11  ;;  %v421_v10 = vld [vmem:[#allocation7 + $0x38] sm:$0xff]  ;;  %v4793_v11 = vcombine.low %v918_v54, %v922_v55  ;;  %v4294_v18 = vcombine.high %v416_v6, %v420_v8  ;;  %v456_v55 = vld [vmem:[#allocation7 + $0x150] sm:$0xff] }
 0x1e7   :  { %v4296_v19 = vcombine.high %v417_v9, %v421_v10  ;;  %v4295_v25 = vcombine.low %v417_v9, %v421_v10  ;;  %v465_v9 = vld [vmem:[#allocation7 + $0x198] sm:$0xff] }
 0x1e8   :  { %v469_v10 = vld [vmem:[#allocation7 + $0x1b8] sm:$0xff] }
 0x1e9   :  { %3672 = vmatpush1.bf16.msra.mxu0 %v4753_v20  ;;  %3836 = vmatpush1.bf16.msra.mxu1 %v4755_v21  ;;  %v424_v20 = vld [vmem:[#allocation7 + $0x50] sm:$0xff] }
 0x1ea   :  { %3673 = vmatprep.subr.bf16.mxu0 %v4762_v22  ;;  %3837 = vmatprep.subr.bf16.mxu1 %v4764_v23  ;;  %v428_v21 = vld [vmem:[#allocation7 + $0x70] sm:$0xff]  ;;  %v429_v22 = vld [vmem:[#allocation7 + $0x78] sm:$0xff]  ;;  %v4293_v23 = vcombine.low %v416_v6, %v420_v8 }
 0x1eb   :  { %v4302_v26 = vcombine.high %v424_v20, %v428_v21  ;;  %v4304_v46 = vcombine.high %v425_v62, %v429_v22  ;;  %v4301_v30 = vcombine.low %v424_v20, %v428_v21  ;;  %v4303_v31 = vcombine.low %v425_v62, %v429_v22  ;;  %v464_v6 = vld [vmem:[#allocation7 + $0x190] sm:$0xff]  ;;  %v473_v21 = vld [vmem:[#allocation7 + $0x1d8] sm:$0xff] }
 0x1ec   :  { %v468_v8 = vld [vmem:[#allocation7 + $0x1b0] sm:$0xff]  ;;  %v477_v62 = vld [vmem:[#allocation7 + $0x1f8] sm:$0xff] }
 0x1ed   :  { %3674 = vmatpush1.bf16.msra.mxu0 %v4761_v27  ;;  %3838 = vmatpush1.bf16.msra.mxu1 %v4763_v15  ;;  %v432_v27 = vld [vmem:[#allocation7 + $0x90] sm:$0xff]  ;;  %v4342_v17 = vcombine.high %v464_v6, %v468_v8  ;;  %v4341_v22 = vcombine.low %v464_v6, %v468_v8  ;;  %v513_v8 = vld [vmem:[#allocation7 + $0x318] sm:$0xff] }
 0x1ee   :  { %3675 = vmatprep.subr.bf16.mxu0 %v4770_v28  ;;  %3839 = vmatprep.subr.bf16.mxu1 %v4772_v29  ;;  %v436_v15 = vld [vmem:[#allocation7 + $0xb0] sm:$0xff]  ;;  %v433_v28 = vld [vmem:[#allocation7 + $0x98] sm:$0xff] }
 0x1ef   :  { %v437_v29 = vld [vmem:[#allocation7 + $0xb8] sm:$0xff]  ;;  %v4310_v32 = vcombine.high %v432_v27, %v436_v15  ;;  %v4309_v39 = vcombine.low %v432_v27, %v436_v15  ;;  %v476_v20 = vld [vmem:[#allocation7 + $0x1f0] sm:$0xff] }
 0x1f0   :  { %v4312_v33 = vcombine.high %v433_v28, %v437_v29  ;;  %v4311_v57 = vcombine.low %v433_v28, %v437_v29  ;;  %v484_v27 = vld [vmem:[#allocation7 + $0x230] sm:$0xff]  ;;  %v481_v15 = vld [vmem:[#allocation7 + $0x218] sm:$0xff] }
 0x1f1   :  { %3676 = vmatpush1.bf16.msra.mxu0 %v4769_v35  ;;  %3840 = vmatpush1.bf16.msra.mxu1 %v4771_v4  ;;  %v440_v35 = vld [vmem:[#allocation7 + $0xd0] sm:$0xff]  ;;  %v485_v28 = vld [vmem:[#allocation7 + $0x238] sm:$0xff] }
 0x1f2   :  { %3677 = vmatprep.subr.bf16.mxu0 %v4778_v37  ;;  %3841 = vmatprep.subr.bf16.mxu1 %v4780_v38  ;;  %v444_v4 = vld [vmem:[#allocation7 + $0xf0] sm:$0xff]  ;;  %v441_v37 = vld [vmem:[#allocation7 + $0xd8] sm:$0xff] }
 0x1f3   :  { %v445_v38 = vld [vmem:[#allocation7 + $0xf8] sm:$0xff]  ;;  %v4318_v40 = vcombine.high %v440_v35, %v444_v4  ;;  %v4317_v16 = vcombine.low %v440_v35, %v444_v4  ;;  %v492_v35 = vld [vmem:[#allocation7 + $0x270] sm:$0xff] }
 0x1f4   :  { %v4320_v42 = vcombine.high %v441_v37, %v445_v38  ;;  %v489_v4 = vld [vmem:[#allocation7 + $0x258] sm:$0xff]  ;;  %v516_v6 = vld [vmem:[#allocation7 + $0x330] sm:$0xff] }
 0x1f5   :  { %3678 = vmatpush1.bf16.msra.mxu0 %v4777_v43  ;;  %3842 = vmatpush1.bf16.msra.mxu1 %v4779_v50  ;;  %v448_v43 = vld [vmem:[#allocation7 + $0x110] sm:$0xff] }
 0x1f6   :  { %3679 = vmatprep.subr.bf16.mxu0 %v4786_v53  ;;  %3843 = vmatprep.subr.bf16.mxu1 %v4788_v44  ;;  %v452_v50 = vld [vmem:[#allocation7 + $0x130] sm:$0xff]  ;;  %v4319_v53 = vcombine.low %v441_v37, %v445_v38  ;;  %v493_v37 = vld [vmem:[#allocation7 + $0x278] sm:$0xff] }
 0x1f7   :  { %v4326_v44 = vcombine.high %v448_v43, %v452_v50 }
 0x1f9   :  { %3680 = vmatpush1.bf16.msra.mxu0 %v4785_v61  ;;  %3844 = vmatpush1.bf16.msra.mxu1 %v4787_v63  ;;  %v461_v61 = vld [vmem:[#allocation7 + $0x178] sm:$0xff]  ;;  %v4325_v63 = vcombine.low %v448_v43, %v452_v50  ;;  %v500_v43 = vld [vmem:[#allocation7 + $0x2b0] sm:$0xff] }
 0x1fa   :  { %3681 = vmatprep.subr.bf16.mxu0 %v4794_v2  ;;  %3845 = vmatprep.subr.bf16.mxu1 %v4796_v3  ;;  %v4334_v2 = vcombine.high %v456_v55, %v460_v56  ;;  %v4336_v3 = vcombine.high %v457_v58, %v461_v61  ;;  %v497_v50 = vld [vmem:[#allocation7 + $0x298] sm:$0xff] }
 0x1fd   :  { %3682 = vmatpush1.bf16.msra.mxu0 %v4793_v11  ;;  %3846 = vmatpush1.bf16.msra.mxu1 %v4795_v12  ;;  %v4333_v11 = vcombine.low %v456_v55, %v460_v56  ;;  %v4335_v12 = vcombine.low %v457_v58, %v461_v61  ;;  %v508_v55 = vld [vmem:[#allocation7 + $0x2f0] sm:$0xff]  ;;  %v505_v56 = vld [vmem:[#allocation7 + $0x2d8] sm:$0xff] }
 0x1fe   :  { %3856 = vmatprep.subr.bf16.mxu0 %v4294_v18  ;;  %4020 = vmatprep.subr.bf16.mxu1 %v4296_v19  ;;  %v4344_v18 = vcombine.high %v465_v9, %v469_v10  ;;  %v472_v19 = vld [vmem:[#allocation7 + $0x1d0] sm:$0xff]  ;;  %v509_v58 = vld [vmem:[#allocation7 + $0x2f8] sm:$0xff] }
 0x1ff   :  { %v4349_v29 = vcombine.low %v472_v19, %v476_v20 }
 0x200   :  { %3684 = vmatmul.mubr.bf16.vlgmr.msra.gmra.mrb[8].mxu0 %v5188_v24  ;;  %3848 = vmatmul.mubr.bf16.vlgmr.msra.gmra.mrb[8].mxu1 %v5188_v24 }
 0x201   :  { %3857 = vmatpush1.bf16.msra.mxu0 %v4293_v23  ;;  %3888 = vmatprep.mubr.bf16.mxu0 %v5123_v5  ;;  %v4343_v23 = vcombine.low %v465_v9, %v469_v10  ;;  %v517_v9 = vld [vmem:[#allocation7 + $0x338] sm:$0xff] }
 0x202   :  { %4021 = vmatpush1.bf16.msra.mxu1 %v4295_v25  ;;  %4052 = vmatprep.mubr.bf16.mxu1 %v5123_v5  ;;  %v449_v5 = vld [vmem:[#allocation7 + $0x118] sm:$0xff]  ;;  %v4350_v25 = vcombine.high %v472_v19, %v476_v20  ;;  %v524_v19 = vld [vmem:[#allocation7 + $0x370] sm:$0xff] }
 0x203   :  { %3858 = vmatprep.subr.bf16.mxu0 %v4302_v26  ;;  %4022 = vmatprep.subr.bf16.mxu1 %v4304_v46  ;;  %v4328_v54 = vcombine.high %v449_v5, %v453_v52  ;;  %v4327_v0 = vcombine.low %v449_v5, %v453_v52  ;;  %v4352_v26 = vcombine.high %v473_v21, %v477_v62  ;;  %v480_v46 = vld [vmem:[#allocation7 + $0x210] sm:$0xff]  ;;  %v501_v5 = vld [vmem:[#allocation7 + $0x2b8] sm:$0xff] }
 0x204   :  { %v4357_v38 = vcombine.low %v480_v46, %v484_v27  ;;  %v521_v20 = vld [vmem:[#allocation7 + $0x358] sm:$0xff] }
 0x205   :  { %3859 = vmatpush1.bf16.msra.mxu0 %v4301_v30  ;;  %v4351_v30 = vcombine.low %v473_v21, %v477_v62  ;;  %v525_v21 = vld [vmem:[#allocation7 + $0x378] sm:$0xff] }
 0x206   :  { %4023 = vmatpush1.bf16.msra.mxu1 %v4303_v31  ;;  %3860 = vmatprep.subr.bf16.mxu0 %v4310_v32  ;;  %v4358_v31 = vcombine.high %v480_v46, %v484_v27  ;;  %v4360_v32 = vcombine.high %v481_v15, %v485_v28  ;;  %v532_v46 = vld [vmem:[#allocation7 + $0x3b0] sm:$0xff]  ;;  %v529_v27 = vld [vmem:[#allocation7 + $0x398] sm:$0xff] }
 0x207   :  { %4024 = vmatprep.subr.bf16.mxu1 %v4312_v33  ;;  %v488_v33 = vld [vmem:[#allocation7 + $0x250] sm:$0xff] }
 0x208   :  { %v4365_v52 = vcombine.low %v488_v33, %v492_v35 }
 0x209   :  { %3861 = vmatpush1.bf16.msra.mxu0 %v4309_v39  ;;  %v4359_v39 = vcombine.low %v481_v15, %v485_v28  ;;  %v533_v15 = vld [vmem:[#allocation7 + $0x3b8] sm:$0xff] }
 0x20a   :  { %4025 = vmatpush1.bf16.msra.mxu1 %v4311_v57  ;;  %3862 = vmatprep.subr.bf16.mxu0 %v4318_v40  ;;  %v4366_v57 = vcombine.high %v488_v33, %v492_v35  ;;  %v4368_v40 = vcombine.high %v489_v4, %v493_v37  ;;  %v540_v33 = vld [vmem:[#allocation7 + $0x3f0] sm:$0xff]  ;;  %v537_v35 = vld [vmem:[#allocation7 + $0x3d8] sm:$0xff] }
 0x20b   :  { %4026 = vmatprep.subr.bf16.mxu1 %v4320_v42  ;;  %v496_v42 = vld [vmem:[#allocation7 + $0x290] sm:$0xff] }
 0x20c   :  { %v4373_v61 = vcombine.low %v496_v42, %v500_v43 }
 0x20d   :  { %3863 = vmatpush1.bf16.msra.mxu0 %v4317_v16  ;;  %v4367_v16 = vcombine.low %v489_v4, %v493_v37  ;;  %v541_v4 = vld [vmem:[#allocation7 + $0x3f8] sm:$0xff] }
 0x20e   :  { %4027 = vmatpush1.bf16.msra.mxu1 %v4319_v53  ;;  %3864 = vmatprep.subr.bf16.mxu0 %v4326_v44  ;;  %v4374_v53 = vcombine.high %v496_v42, %v500_v43  ;;  %v4376_v44 = vcombine.high %v497_v50, %v501_v5  ;;  %v548_v42 = vld [vmem:[#allocation7 + $0x430] sm:$0xff]  ;;  %v545_v43 = vld [vmem:[#allocation7 + $0x418] sm:$0xff] }
 0x20f   :  { %4028 = vmatprep.subr.bf16.mxu1 %v4328_v54  ;;  %v504_v54 = vld [vmem:[#allocation7 + $0x2d0] sm:$0xff] }
 0x210   :  { %v4381_v10 = vcombine.low %v504_v54, %v508_v55 }
 0x211   :  { %3865 = vmatpush1.bf16.msra.mxu0 %v4325_v63  ;;  %v4375_v63 = vcombine.low %v497_v50, %v501_v5  ;;  %v549_v50 = vld [vmem:[#allocation7 + $0x438] sm:$0xff] }
 0x212   :  { %4029 = vmatpush1.bf16.msra.mxu1 %v4327_v0  ;;  %3866 = vmatprep.subr.bf16.mxu0 %v4334_v2  ;;  %v4382_v0 = vcombine.high %v504_v54, %v508_v55  ;;  %v4384_v2 = vcombine.high %v505_v56, %v509_v58  ;;  %v556_v54 = vld [vmem:[#allocation7 + $0x470] sm:$0xff] }
 0x213   :  { %4030 = vmatprep.subr.bf16.mxu1 %v4336_v3  ;;  %v512_v3 = vld [vmem:[#allocation7 + $0x310] sm:$0xff] }
 0x214   :  { %v4389_v62 = vcombine.low %v512_v3, %v516_v6 }
 0x215   :  { %3867 = vmatpush1.bf16.msra.mxu0 %v4333_v11  ;;  %v4383_v11 = vcombine.low %v505_v56, %v509_v58  ;;  %v553_v56 = vld [vmem:[#allocation7 + $0x458] sm:$0xff] }
 0x216   :  { %4031 = vmatpush1.bf16.msra.mxu1 %v4335_v12  ;;  %3868 = vmatprep.subr.bf16.mxu0 %v4342_v17  ;;  %v4390_v12 = vcombine.high %v512_v3, %v516_v6  ;;  %v4392_v17 = vcombine.high %v513_v8, %v517_v9  ;;  %v557_v58 = vld [vmem:[#allocation7 + $0x478] sm:$0xff] }
 0x217   :  { %4032 = vmatprep.subr.bf16.mxu1 %v4344_v18  ;;  %v520_v18 = vld [vmem:[#allocation7 + $0x350] sm:$0xff]  ;;  %v4432_v3 = vcombine.high %v553_v56, %v557_v58  ;;  %v561_v6 = vld [vmem:[#allocation7 + $0x498] sm:$0xff] }
 0x218   :  { %v4397_v28 = vcombine.low %v520_v18, %v524_v19 }
 0x219   :  { %3869 = vmatpush1.bf16.msra.mxu0 %v4341_v22  ;;  %v4391_v22 = vcombine.low %v513_v8, %v517_v9  ;;  %v565_v8 = vld [vmem:[#allocation7 + $0x4b8] sm:$0xff] }
 0x21a   :  { %4033 = vmatpush1.bf16.msra.mxu1 %v4343_v23  ;;  %3870 = vmatprep.subr.bf16.mxu0 %v4350_v25  ;;  %v4398_v23 = vcombine.high %v520_v18, %v524_v19  ;;  %v4400_v25 = vcombine.high %v521_v20, %v525_v21  ;;  %v572_v18 = vld [vmem:[#allocation7 + $0x4f0] sm:$0xff]  ;;  %v569_v19 = vld [vmem:[#allocation7 + $0x4d8] sm:$0xff] }
 0x21b   :  { %4034 = vmatprep.subr.bf16.mxu1 %v4352_v26  ;;  %v528_v26 = vld [vmem:[#allocation7 + $0x390] sm:$0xff] }
 0x21c   :  { %v4405_v37 = vcombine.low %v528_v26, %v532_v46 }
 0x21d   :  { %3871 = vmatpush1.bf16.msra.mxu0 %v4349_v29  ;;  %v4399_v29 = vcombine.low %v521_v20, %v525_v21  ;;  %v573_v20 = vld [vmem:[#allocation7 + $0x4f8] sm:$0xff] }
 0x21e   :  { %4035 = vmatpush1.bf16.msra.mxu1 %v4351_v30  ;;  %3872 = vmatprep.subr.bf16.mxu0 %v4358_v31  ;;  %v4406_v30 = vcombine.high %v528_v26, %v532_v46  ;;  %v4408_v31 = vcombine.high %v529_v27, %v533_v15  ;;  %v577_v26 = vld [vmem:[#allocation7 + $0x518] sm:$0xff] }
 0x21f   :  { %4036 = vmatprep.subr.bf16.mxu1 %v4360_v32  ;;  %v536_v32 = vld [vmem:[#allocation7 + $0x3d0] sm:$0xff]  ;;  %v581_v46 = vld [vmem:[#allocation7 + $0x538] sm:$0xff] }
 0x220   :  { %v4413_v5 = vcombine.low %v536_v32, %v540_v33 }
 0x221   :  { %3873 = vmatpush1.bf16.msra.mxu0 %v4357_v38  ;;  %v4407_v38 = vcombine.low %v529_v27, %v533_v15  ;;  %v4447_v27 = vcombine.low %v569_v19, %v573_v20 }
 0x222   :  { %4037 = vmatpush1.bf16.msra.mxu1 %v4359_v39  ;;  %3874 = vmatprep.subr.bf16.mxu0 %v4366_v57  ;;  %v4414_v39 = vcombine.high %v536_v32, %v540_v33  ;;  %v4416_v57 = vcombine.high %v537_v35, %v541_v4  ;;  %v589_v32 = vld [vmem:[#allocation7 + $0x578] sm:$0xff] }
 0x223   :  { %4038 = vmatprep.subr.bf16.mxu1 %v4368_v40  ;;  %v544_v40 = vld [vmem:[#allocation7 + $0x410] sm:$0xff] }
 0x224   :  { %v4421_v55 = vcombine.low %v544_v40, %v548_v42 }
 0x225   :  { %3875 = vmatpush1.bf16.msra.mxu0 %v4365_v52  ;;  %v4415_v52 = vcombine.low %v537_v35, %v541_v4  ;;  %v4455_v35 = vcombine.low %v577_v26, %v581_v46 }
 0x226   :  { %4039 = vmatpush1.bf16.msra.mxu1 %v4367_v16  ;;  %3876 = vmatprep.subr.bf16.mxu0 %v4374_v53  ;;  %v4422_v16 = vcombine.high %v544_v40, %v548_v42  ;;  %v4424_v53 = vcombine.high %v545_v43, %v549_v50  ;;  %v597_v40 = vld [vmem:[#allocation7 + $0x5b8] sm:$0xff] }
 0x227   :  { %4040 = vmatprep.subr.bf16.mxu1 %v4376_v44  ;;  %v552_v44 = vld [vmem:[#allocation7 + $0x450] sm:$0xff] }
 0x228   :  { %v4429_v9 = vcombine.low %v552_v44, %v556_v54 }
 0x229   :  { %3877 = vmatpush1.bf16.msra.mxu0 %v4373_v61  ;;  %v4423_v61 = vcombine.low %v545_v43, %v549_v50 }
 0x22a   :  { %4041 = vmatpush1.bf16.msra.mxu1 %v4375_v63  ;;  %3878 = vmatprep.subr.bf16.mxu0 %v4382_v0  ;;  %v4430_v63 = vcombine.high %v552_v44, %v556_v54  ;;  %v560_v0 = vld [vmem:[#allocation7 + $0x490] sm:$0xff]  ;;  %v605_v44 = vld [vmem:[#allocation7 + $0x5f8] sm:$0xff] }
 0x22b   :  { %4042 = vmatprep.subr.bf16.mxu1 %v4384_v2  ;;  %v564_v2 = vld [vmem:[#allocation7 + $0x4b0] sm:$0xff] }
 0x22c   :  { %v4437_v21 = vcombine.low %v560_v0, %v564_v2 }
 0x22d   :  { %3879 = vmatpush1.bf16.msra.mxu0 %v4381_v10  ;;  %v4431_v10 = vcombine.low %v553_v56, %v557_v58 }
 0x22e   :  { %4043 = vmatpush1.bf16.msra.mxu1 %v4383_v11  ;;  %3880 = vmatprep.subr.bf16.mxu0 %v4390_v12  ;;  %v4438_v11 = vcombine.high %v560_v0, %v564_v2  ;;  %v4440_v12 = vcombine.high %v561_v6, %v565_v8  ;;  %v609_v0 = vld [vmem:[#allocation7 + $0x618] sm:$0xff] }
 0x22f   :  { %4044 = vmatprep.subr.bf16.mxu1 %v4392_v17  ;;  %v568_v17 = vld [vmem:[#allocation7 + $0x4d0] sm:$0xff]  ;;  %v613_v2 = vld [vmem:[#allocation7 + $0x638] sm:$0xff] }
 0x231   :  { %3881 = vmatpush1.bf16.msra.mxu0 %v4389_v62  ;;  %v4446_v62 = vcombine.high %v568_v17, %v572_v18 }
 0x232   :  { %4045 = vmatpush1.bf16.msra.mxu1 %v4391_v22  ;;  %3882 = vmatprep.subr.bf16.mxu0 %v4398_v23  ;;  %v4448_v22 = vcombine.high %v569_v19, %v573_v20  ;;  %v576_v23 = vld [vmem:[#allocation7 + $0x510] sm:$0xff]  ;;  %v4487_v19 = vcombine.low %v609_v0, %v613_v2 }
 0x233   :  { %4046 = vmatprep.subr.bf16.mxu1 %v4400_v25  ;;  %v580_v25 = vld [vmem:[#allocation7 + $0x530] sm:$0xff] }
 0x234   :  { %v4454_v15 = vcombine.high %v576_v23, %v580_v25  ;;  %v4453_v33 = vcombine.low %v576_v23, %v580_v25  ;;  %v629_v23 = vld [vmem:[#allocation7 + $0x6b8] sm:$0xff] }
 0x235   :  { %3883 = vmatpush1.bf16.msra.mxu0 %v4397_v28  ;;  %v4456_v28 = vcombine.high %v577_v26, %v581_v46 }
 0x236   :  { %4047 = vmatpush1.bf16.msra.mxu1 %v4399_v29  ;;  %3884 = vmatprep.subr.bf16.mxu0 %v4406_v30  ;;  %v584_v29 = vld [vmem:[#allocation7 + $0x550] sm:$0xff] }
 0x237   :  { %4048 = vmatprep.subr.bf16.mxu1 %v4408_v31  ;;  %v588_v30 = vld [vmem:[#allocation7 + $0x570] sm:$0xff]  ;;  %v585_v31 = vld [vmem:[#allocation7 + $0x558] sm:$0xff] }
 0x238   :  { %v4462_v4 = vcombine.high %v584_v29, %v588_v30  ;;  %v4461_v42 = vcombine.low %v584_v29, %v588_v30  ;;  %v4463_v43 = vcombine.low %v585_v31, %v589_v32  ;;  %v637_v29 = vld [vmem:[#allocation7 + $0x6f8] sm:$0xff] }
 0x239   :  { %3885 = vmatpush1.bf16.msra.mxu0 %v4405_v37  ;;  %v4464_v37 = vcombine.high %v585_v31, %v589_v32 }
 0x23a   :  { %4049 = vmatpush1.bf16.msra.mxu1 %v4407_v38  ;;  %3886 = vmatprep.subr.bf16.mxu0 %v4414_v39  ;;  %v592_v38 = vld [vmem:[#allocation7 + $0x590] sm:$0xff] }
 0x23b   :  { %4050 = vmatprep.subr.bf16.mxu1 %v4416_v57  ;;  %v596_v39 = vld [vmem:[#allocation7 + $0x5b0] sm:$0xff]  ;;  %v593_v57 = vld [vmem:[#allocation7 + $0x598] sm:$0xff] }
 0x23c   :  { %v4470_v50 = vcombine.high %v592_v38, %v596_v39  ;;  %v4469_v54 = vcombine.low %v592_v38, %v596_v39  ;;  %v645_v38 = vld [vmem:[#allocation7 + $0x738] sm:$0xff] }
 0x23d   :  { %3887 = vmatpush1.bf16.msra.mxu0 %v4413_v5  ;;  %v4472_v5 = vcombine.high %v593_v57, %v597_v40 }
 0x23e   :  { %4051 = vmatpush1.bf16.msra.mxu1 %v4415_v52  ;;  %3897 = vmatprep.subr.bf16.mxu0 %v4422_v16  ;;  %v600_v52 = vld [vmem:[#allocation7 + $0x5d0] sm:$0xff] }
 0x23f   :  { %4061 = vmatprep.subr.bf16.mxu1 %v4424_v53  ;;  %v604_v16 = vld [vmem:[#allocation7 + $0x5f0] sm:$0xff]  ;;  %v601_v53 = vld [vmem:[#allocation7 + $0x5d8] sm:$0xff] }
 0x240   :  { %3889 = vmatmul.mubr.bf16.vlgmr.msra.gmra.mrb[12].mxu0 %v5125_v7  ;;  %v4478_v56 = vcombine.high %v600_v52, %v604_v16  ;;  %v4480_v58 = vcombine.high %v601_v53, %v605_v44 }
 0x241   :  { %4053 = vmatmul.mubr.bf16.vlgmr.msra.gmra.mrb[12].mxu1 %v5125_v7  ;;  %3898 = vmatpush1.bf16.msra.mxu0 %v4421_v55  ;;  %v4439_v7 = vcombine.low %v561_v6, %v565_v8  ;;  %v4471_v55 = vcombine.low %v593_v57, %v597_v40  ;;  %v4479_v6 = vcombine.low %v601_v53, %v605_v44 }
 0x242   :  { %3929 = vmatprep.mubr.bf16.mxu0 %v5129_v14  ;;  %4062 = vmatpush1.bf16.msra.mxu1 %v4423_v61  ;;  %v608_v61 = vld [vmem:[#allocation7 + $0x610] sm:$0xff] }
 0x243   :  { %4093 = vmatprep.mubr.bf16.mxu1 %v5129_v14  ;;  %3899 = vmatprep.subr.bf16.mxu0 %v4430_v63  ;;  %v4445_v14 = vcombine.low %v568_v17, %v572_v18  ;;  %v612_v63 = vld [vmem:[#allocation7 + $0x630] sm:$0xff]  ;;  %v621_v17 = vld [vmem:[#allocation7 + $0x678] sm:$0xff] }
 0x244   :  { %4063 = vmatprep.subr.bf16.mxu1 %v4432_v3  ;;  %v4477_v3 = vcombine.low %v600_v52, %v604_v16  ;;  %v4486_v8 = vcombine.high %v608_v61, %v612_v63  ;;  %v4485_v18 = vcombine.low %v608_v61, %v612_v63  ;;  %v653_v52 = vld [vmem:[#allocation7 + $0x778] sm:$0xff] }
 0x245   :  { %3900 = vmatpush1.bf16.msra.mxu0 %v4429_v9  ;;  %v4488_v9 = vcombine.high %v609_v0, %v613_v2  ;;  %v661_v61 = vld [vmem:[#allocation7 + $0x7b8] sm:$0xff] }
 0x246   :  { %4064 = vmatpush1.bf16.msra.mxu1 %v4431_v10  ;;  %3901 = vmatprep.subr.bf16.mxu0 %v4438_v11  ;;  %v616_v10 = vld [vmem:[#allocation7 + $0x650] sm:$0xff] }
 0x247   :  { %4065 = vmatprep.subr.bf16.mxu1 %v4440_v12  ;;  %v620_v11 = vld [vmem:[#allocation7 + $0x670] sm:$0xff]  ;;  %v617_v12 = vld [vmem:[#allocation7 + $0x658] sm:$0xff] }
 0x248   :  { %v4494_v20 = vcombine.high %v616_v10, %v620_v11  ;;  %v4493_v25 = vcombine.low %v616_v10, %v620_v11  ;;  %v4495_v26 = vcombine.low %v617_v12, %v621_v17  ;;  %v669_v10 = vld [vmem:[#allocation7 + $0x7f8] sm:$0xff] }
 0x249   :  { %3902 = vmatpush1.bf16.msra.mxu0 %v4437_v21  ;;  %v4496_v21 = vcombine.high %v617_v12, %v621_v17 }
 0x24a   :  { %4066 = vmatpush1.bf16.msra.mxu1 %v4439_v7  ;;  %3903 = vmatprep.subr.bf16.mxu0 %v4446_v62  ;;  %v624_v7 = vld [vmem:[#allocation7 + $0x690] sm:$0xff] }
 0x24b   :  { %4067 = vmatprep.subr.bf16.mxu1 %v4448_v22  ;;  %v628_v62 = vld [vmem:[#allocation7 + $0x6b0] sm:$0xff]  ;;  %v625_v22 = vld [vmem:[#allocation7 + $0x698] sm:$0xff] }
 0x24c   :  { %v4502_v46 = vcombine.high %v624_v7, %v628_v62  ;;  %v4501_v30 = vcombine.low %v624_v7, %v628_v62  ;;  %v4503_v31 = vcombine.low %v625_v22, %v629_v23  ;;  %v677_v7 = vld [vmem:[#allocation7 + $0x838] sm:$0xff] }
 0x24d   :  { %3904 = vmatpush1.bf16.msra.mxu0 %v4445_v14  ;;  %v4504_v14 = vcombine.high %v625_v22, %v629_v23 }
 0x24e   :  { %4068 = vmatpush1.bf16.msra.mxu1 %v4447_v27  ;;  %3905 = vmatprep.subr.bf16.mxu0 %v4454_v15  ;;  %v632_v27 = vld [vmem:[#allocation7 + $0x6d0] sm:$0xff] }
 0x24f   :  { %4069 = vmatprep.subr.bf16.mxu1 %v4456_v28  ;;  %v636_v15 = vld [vmem:[#allocation7 + $0x6f0] sm:$0xff]  ;;  %v633_v28 = vld [vmem:[#allocation7 + $0x6d8] sm:$0xff] }
 0x250   :  { %v4510_v32 = vcombine.high %v632_v27, %v636_v15  ;;  %v4509_v39 = vcombine.low %v632_v27, %v636_v15  ;;  %v4511_v57 = vcombine.low %v633_v28, %v637_v29  ;;  %v681_v27 = vld [vmem:[#allocation7 + $0x858] sm:$0xff] }
 0x251   :  { %3906 = vmatpush1.bf16.msra.mxu0 %v4453_v33  ;;  %v4512_v33 = vcombine.high %v633_v28, %v637_v29  ;;  %v685_v15 = vld [vmem:[#allocation7 + $0x878] sm:$0xff] }
 0x252   :  { %4070 = vmatpush1.bf16.msra.mxu1 %v4455_v35  ;;  %3907 = vmatprep.subr.bf16.mxu0 %v4462_v4  ;;  %v640_v35 = vld [vmem:[#allocation7 + $0x710] sm:$0xff] }
 0x253   :  { %4071 = vmatprep.subr.bf16.mxu1 %v4464_v37  ;;  %v644_v4 = vld [vmem:[#allocation7 + $0x730] sm:$0xff]  ;;  %v641_v37 = vld [vmem:[#allocation7 + $0x718] sm:$0xff] }
 0x254   :  { %v4518_v40 = vcombine.high %v640_v35, %v644_v4  ;;  %v4517_v16 = vcombine.low %v640_v35, %v644_v4  ;;  %v4519_v53 = vcombine.low %v641_v37, %v645_v38  ;;  %v693_v35 = vld [vmem:[#allocation7 + $0x8b8] sm:$0xff] }
 0x255   :  { %3908 = vmatpush1.bf16.msra.mxu0 %v4461_v42  ;;  %v4520_v42 = vcombine.high %v641_v37, %v645_v38  ;;  %v4559_v37 = vcombine.low %v681_v27, %v685_v15 }
 0x256   :  { %4072 = vmatpush1.bf16.msra.mxu1 %v4463_v43  ;;  %3909 = vmatprep.subr.bf16.mxu0 %v4470_v50  ;;  %v648_v43 = vld [vmem:[#allocation7 + $0x750] sm:$0xff] }
 0x257   :  { %4073 = vmatprep.subr.bf16.mxu1 %v4472_v5  ;;  %v652_v50 = vld [vmem:[#allocation7 + $0x770] sm:$0xff]  ;;  %v649_v5 = vld [vmem:[#allocation7 + $0x758] sm:$0xff] }
 0x258   :  { %v4526_v44 = vcombine.high %v648_v43, %v652_v50  ;;  %v4525_v63 = vcombine.low %v648_v43, %v652_v50  ;;  %v4527_v0 = vcombine.low %v649_v5, %v653_v52  ;;  %v701_v43 = vld [vmem:[#allocation7 + $0x8f8] sm:$0xff] }
 0x259   :  { %3910 = vmatpush1.bf16.msra.mxu0 %v4469_v54  ;;  %v4528_v54 = vcombine.high %v649_v5, %v653_v52 }
 0x25a   :  { %4074 = vmatpush1.bf16.msra.mxu1 %v4471_v55  ;;  %3911 = vmatprep.subr.bf16.mxu0 %v4478_v56  ;;  %v656_v55 = vld [vmem:[#allocation7 + $0x790] sm:$0xff] }
 0x25b   :  { %4075 = vmatprep.subr.bf16.mxu1 %v4480_v58  ;;  %v660_v56 = vld [vmem:[#allocation7 + $0x7b0] sm:$0xff]  ;;  %v657_v58 = vld [vmem:[#allocation7 + $0x798] sm:$0xff] }
 0x25c   :  { %v4534_v2 = vcombine.high %v656_v55, %v660_v56  ;;  %v4533_v11 = vcombine.low %v656_v55, %v660_v56  ;;  %v4535_v12 = vcombine.low %v657_v58, %v661_v61 }
 0x25d   :  { %3912 = vmatpush1.bf16.msra.mxu0 %v4477_v3  ;;  %v4536_v3 = vcombine.high %v657_v58, %v661_v61  ;;  %v712_v61 = vld [vmem:[#allocation7 + $0x950] sm:$0xff] }
 0x25e   :  { %4076 = vmatpush1.bf16.msra.mxu1 %v4479_v6  ;;  %3913 = vmatprep.subr.bf16.mxu0 %v4486_v8  ;;  %v664_v6 = vld [vmem:[#allocation7 + $0x7d0] sm:$0xff] }
 0x25f   :  { %4077 = vmatprep.subr.bf16.mxu1 %v4488_v9  ;;  %v668_v8 = vld [vmem:[#allocation7 + $0x7f0] sm:$0xff]  ;;  %v665_v9 = vld [vmem:[#allocation7 + $0x7d8] sm:$0xff] }
 0x260   :  { %v4542_v17 = vcombine.high %v664_v6, %v668_v8  ;;  %v4541_v62 = vcombine.low %v664_v6, %v668_v8  ;;  %v4543_v22 = vcombine.low %v665_v9, %v669_v10 }
 0x261   :  { %3914 = vmatpush1.bf16.msra.mxu0 %v4485_v18  ;;  %v4544_v18 = vcombine.high %v665_v9, %v669_v10  ;;  %v720_v10 = vld [vmem:[#allocation7 + $0x990] sm:$0xff] }
 0x262   :  { %4078 = vmatpush1.bf16.msra.mxu1 %v4487_v19  ;;  %3915 = vmatprep.subr.bf16.mxu0 %v4494_v20  ;;  %v672_v19 = vld [vmem:[#allocation7 + $0x810] sm:$0xff] }
 0x263   :  { %4079 = vmatprep.subr.bf16.mxu1 %v4496_v21  ;;  %v676_v20 = vld [vmem:[#allocation7 + $0x830] sm:$0xff]  ;;  %v673_v21 = vld [vmem:[#allocation7 + $0x818] sm:$0xff] }
 0x264   :  { %v4550_v23 = vcombine.high %v672_v19, %v676_v20  ;;  %v4551_v28 = vcombine.low %v673_v21, %v677_v7 }
 0x265   :  { %3916 = vmatpush1.bf16.msra.mxu0 %v4493_v25  ;;  %v4552_v25 = vcombine.high %v673_v21, %v677_v7  ;;  %v728_v7 = vld [vmem:[#allocation7 + $0x9d0] sm:$0xff] }
 0x266   :  { %4080 = vmatpush1.bf16.msra.mxu1 %v4495_v26  ;;  %3917 = vmatprep.subr.bf16.mxu0 %v4502_v46  ;;  %v680_v26 = vld [vmem:[#allocation7 + $0x850] sm:$0xff] }
 0x267   :  { %4081 = vmatprep.subr.bf16.mxu1 %v4504_v14  ;;  %v684_v46 = vld [vmem:[#allocation7 + $0x870] sm:$0xff]  ;;  %v4549_v14 = vcombine.low %v672_v19, %v676_v20 }
 0x268   :  { %v4558_v29 = vcombine.high %v680_v26, %v684_v46  ;;  %v4557_v4 = vcombine.low %v680_v26, %v684_v46 }
 0x269   :  { %3918 = vmatpush1.bf16.msra.mxu0 %v4501_v30  ;;  %v688_v30 = vld [vmem:[#allocation7 + $0x890] sm:$0xff] }
 0x26a   :  { %4082 = vmatpush1.bf16.msra.mxu1 %v4503_v31  ;;  %3919 = vmatprep.subr.bf16.mxu0 %v4510_v32  ;;  %v692_v31 = vld [vmem:[#allocation7 + $0x8b0] sm:$0xff]  ;;  %v4560_v32 = vcombine.high %v681_v27, %v685_v15 }
 0x26b   :  { %4083 = vmatprep.subr.bf16.mxu1 %v4512_v33  ;;  %v689_v33 = vld [vmem:[#allocation7 + $0x898] sm:$0xff]  ;;  %v4566_v38 = vcombine.high %v688_v30, %v692_v31  ;;  %v4565_v50 = vcombine.low %v688_v30, %v692_v31  ;;  %v736_v27 = vld [vmem:[#allocation7 + $0xa10] sm:$0xff] }
 0x26c   :  { %v740_v15 = vld [vmem:[#allocation7 + $0xa30] sm:$0xff] }
 0x26d   :  { %3920 = vmatpush1.bf16.msra.mxu0 %v4509_v39  ;;  %v4568_v39 = vcombine.high %v689_v33, %v693_v35 }
 0x26e   :  { %4084 = vmatpush1.bf16.msra.mxu1 %v4511_v57  ;;  %3921 = vmatprep.subr.bf16.mxu0 %v4518_v40  ;;  %v696_v57 = vld [vmem:[#allocation7 + $0x8d0] sm:$0xff] }
 0x26f   :  { %4085 = vmatprep.subr.bf16.mxu1 %v4520_v42  ;;  %v700_v40 = vld [vmem:[#allocation7 + $0x8f0] sm:$0xff]  ;;  %v697_v42 = vld [vmem:[#allocation7 + $0x8d8] sm:$0xff] }
 0x270   :  { %v4574_v5 = vcombine.high %v696_v57, %v700_v40  ;;  %v4576_v52 = vcombine.high %v697_v42, %v701_v43  ;;  %v4575_v55 = vcombine.low %v697_v42, %v701_v43  ;;  %v752_v43 = vld [vmem:[#allocation7 + $0xa90] sm:$0xff] }
 0x271   :  { %3922 = vmatpush1.bf16.msra.mxu0 %v4517_v16  ;;  %v704_v16 = vld [vmem:[#allocation7 + $0x910] sm:$0xff] }
 0x272   :  { %4086 = vmatpush1.bf16.msra.mxu1 %v4519_v53  ;;  %3923 = vmatprep.subr.bf16.mxu0 %v4526_v44  ;;  %v708_v53 = vld [vmem:[#allocation7 + $0x930] sm:$0xff]  ;;  %v705_v44 = vld [vmem:[#allocation7 + $0x918] sm:$0xff] }
 0x273   :  { %4087 = vmatprep.subr.bf16.mxu1 %v4528_v54  ;;  %v709_v54 = vld [vmem:[#allocation7 + $0x938] sm:$0xff]  ;;  %v4582_v56 = vcombine.high %v704_v16, %v708_v53 }
 0x274   :  { %v4584_v58 = vcombine.high %v705_v44, %v709_v54  ;;  %v4583_v6 = vcombine.low %v705_v44, %v709_v54  ;;  %v760_v54 = vld [vmem:[#allocation7 + $0xad0] sm:$0xff] }
 0x275   :  { %3924 = vmatpush1.bf16.msra.mxu0 %v4525_v63  ;;  %v716_v63 = vld [vmem:[#allocation7 + $0x970] sm:$0xff] }
 0x276   :  { %4088 = vmatpush1.bf16.msra.mxu1 %v4527_v0  ;;  %3925 = vmatprep.subr.bf16.mxu0 %v4534_v2  ;;  %v713_v0 = vld [vmem:[#allocation7 + $0x958] sm:$0xff]  ;;  %v4590_v8 = vcombine.high %v712_v61, %v716_v63 }
 0x277   :  { %4089 = vmatprep.subr.bf16.mxu1 %v4536_v3  ;;  %v717_v2 = vld [vmem:[#allocation7 + $0x978] sm:$0xff]  ;;  %v4581_v3 = vcombine.low %v704_v16, %v708_v53 }
 0x278   :  { %v4592_v9 = vcombine.high %v713_v0, %v717_v2  ;;  %v4591_v19 = vcombine.low %v713_v0, %v717_v2  ;;  %v768_v2 = vld [vmem:[#allocation7 + $0xb10] sm:$0xff] }
 0x279   :  { %3926 = vmatpush1.bf16.msra.mxu0 %v4533_v11  ;;  %v724_v11 = vld [vmem:[#allocation7 + $0x9b0] sm:$0xff] }
 0x27a   :  { %4090 = vmatpush1.bf16.msra.mxu1 %v4535_v12  ;;  %3927 = vmatprep.subr.bf16.mxu0 %v4542_v17  ;;  %v721_v12 = vld [vmem:[#allocation7 + $0x998] sm:$0xff]  ;;  %v4598_v20 = vcombine.high %v720_v10, %v724_v11 }
 0x27b   :  { %4091 = vmatprep.subr.bf16.mxu1 %v4544_v18  ;;  %v725_v17 = vld [vmem:[#allocation7 + $0x9b8] sm:$0xff]  ;;  %v4589_v18 = vcombine.low %v712_v61, %v716_v63 }
 0x27c   :  { %v4600_v21 = vcombine.high %v721_v12, %v725_v17  ;;  %v4599_v26 = vcombine.low %v721_v12, %v725_v17  ;;  %v776_v17 = vld [vmem:[#allocation7 + $0xb50] sm:$0xff] }
 0x27d   :  { %3928 = vmatpush1.bf16.msra.mxu0 %v4541_v62  ;;  %v732_v62 = vld [vmem:[#allocation7 + $0x9f0] sm:$0xff] }
 0x27e   :  { %4092 = vmatpush1.bf16.msra.mxu1 %v4543_v22  ;;  %3938 = vmatprep.subr.bf16.mxu0 %v4550_v23  ;;  %v729_v22 = vld [vmem:[#allocation7 + $0x9d8] sm:$0xff]  ;;  %v4606_v46 = vcombine.high %v728_v7, %v732_v62  ;;  %v4605_v30 = vcombine.low %v728_v7, %v732_v62 }
 0x27f   :  { %4102 = vmatprep.subr.bf16.mxu1 %v4552_v25  ;;  %v733_v23 = vld [vmem:[#allocation7 + $0x9f8] sm:$0xff]  ;;  %v4597_v25 = vcombine.low %v720_v10, %v724_v11 }
 0x280   :  { %3930 = vmatmul.mubr.bf16.vlgmr.msra.gmra.mrb[12].mxu0 %v5155_v51  ;;  %v4607_v31 = vcombine.low %v729_v22, %v733_v23 }
 0x281   :  { %4094 = vmatmul.mubr.bf16.vlgmr.msra.gmra.mrb[12].mxu1 %v5155_v51  ;;  %3939 = vmatpush1.bf16.msra.mxu0 %v4549_v14  ;;  %v4567_v51 = vcombine.low %v689_v33, %v693_v35  ;;  %v4608_v14 = vcombine.high %v729_v22, %v733_v23  ;;  %v744_v35 = vld [vmem:[#allocation7 + $0xa50] sm:$0xff] }
 0x282   :  { %3970 = vmatprep.mubr.bf16.mxu0 %v5157_v60  ;;  %4103 = vmatpush1.bf16.msra.mxu1 %v4551_v28  ;;  %v737_v28 = vld [vmem:[#allocation7 + $0xa18] sm:$0xff]  ;;  %v784_v23 = vld [vmem:[#allocation7 + $0xb90] sm:$0xff] }
 0x283   :  { %4134 = vmatprep.mubr.bf16.mxu1 %v5157_v60  ;;  %3940 = vmatprep.subr.bf16.mxu0 %v4558_v29  ;;  %v4573_v60 = vcombine.low %v696_v57, %v700_v40  ;;  %v741_v29 = vld [vmem:[#allocation7 + $0xa38] sm:$0xff] }
 0x284   :  { %4104 = vmatprep.subr.bf16.mxu1 %v4560_v32  ;;  %v4614_v32 = vcombine.high %v736_v27, %v740_v15  ;;  %v4616_v33 = vcombine.high %v737_v28, %v741_v29  ;;  %v4615_v57 = vcombine.low %v737_v28, %v741_v29  ;;  %v792_v29 = vld [vmem:[#allocation7 + $0xbd0] sm:$0xff] }
 0x285   :  { %3941 = vmatpush1.bf16.msra.mxu0 %v4557_v4  ;;  %v748_v4 = vld [vmem:[#allocation7 + $0xa70] sm:$0xff] }
 0x286   :  { %4105 = vmatpush1.bf16.msra.mxu1 %v4559_v37  ;;  %3942 = vmatprep.subr.bf16.mxu0 %v4566_v38  ;;  %v745_v37 = vld [vmem:[#allocation7 + $0xa58] sm:$0xff]  ;;  %v4622_v40 = vcombine.high %v744_v35, %v748_v4 }
 0x287   :  { %4106 = vmatprep.subr.bf16.mxu1 %v4568_v39  ;;  %v749_v38 = vld [vmem:[#allocation7 + $0xa78] sm:$0xff]  ;;  %v4613_v39 = vcombine.low %v736_v27, %v740_v15 }
 0x288   :  { %v4624_v42 = vcombine.high %v745_v37, %v749_v38  ;;  %v4623_v16 = vcombine.low %v745_v37, %v749_v38  ;;  %v800_v38 = vld [vmem:[#allocation7 + $0xc10] sm:$0xff] }
 0x289   :  { %3943 = vmatpush1.bf16.msra.mxu0 %v4565_v50  ;;  %v756_v50 = vld [vmem:[#allocation7 + $0xab0] sm:$0xff] }
 0x28a   :  { %4107 = vmatpush1.bf16.msra.mxu1 %v4567_v51  ;;  %3944 = vmatprep.subr.bf16.mxu0 %v4574_v5  ;;  %v753_v51 = vld [vmem:[#allocation7 + $0xa98] sm:$0xff]  ;;  %v4630_v53 = vcombine.high %v752_v43, %v756_v50 }
 0x28b   :  { %4108 = vmatprep.subr.bf16.mxu1 %v4576_v52  ;;  %v757_v5 = vld [vmem:[#allocation7 + $0xab8] sm:$0xff]  ;;  %v4621_v52 = vcombine.low %v744_v35, %v748_v4 }
 0x28c   :  { %v4632_v44 = vcombine.high %v753_v51, %v757_v5  ;;  %v4631_v61 = vcombine.low %v753_v51, %v757_v5  ;;  %v808_v5 = vld [vmem:[#allocation7 + $0xc50] sm:$0xff] }
 0x28d   :  { %3945 = vmatpush1.bf16.msra.mxu0 %v4573_v60  ;;  %v764_v60 = vld [vmem:[#allocation7 + $0xaf0] sm:$0xff] }
 0x28e   :  { %4109 = vmatpush1.bf16.msra.mxu1 %v4575_v55  ;;  %3946 = vmatprep.subr.bf16.mxu0 %v4582_v56  ;;  %v761_v55 = vld [vmem:[#allocation7 + $0xad8] sm:$0xff]  ;;  %v4638_v63 = vcombine.high %v760_v54, %v764_v60 }
 0x28f   :  { %4110 = vmatprep.subr.bf16.mxu1 %v4584_v58  ;;  %v765_v56 = vld [vmem:[#allocation7 + $0xaf8] sm:$0xff]  ;;  %v4629_v58 = vcombine.low %v752_v43, %v756_v50 }
 0x290   :  { %v4640_v0 = vcombine.high %v761_v55, %v765_v56  ;;  %v4639_v10 = vcombine.low %v761_v55, %v765_v56  ;;  %v816_v55 = vld [vmem:[#allocation7 + $0xc90] sm:$0xff] }
 0x291   :  { %3947 = vmatpush1.bf16.msra.mxu0 %v4581_v3  ;;  %v772_v3 = vld [vmem:[#allocation7 + $0xb30] sm:$0xff] }
 0x292   :  { %4111 = vmatpush1.bf16.msra.mxu1 %v4583_v6  ;;  %3948 = vmatprep.subr.bf16.mxu0 %v4590_v8  ;;  %v769_v6 = vld [vmem:[#allocation7 + $0xb18] sm:$0xff]  ;;  %v4646_v11 = vcombine.high %v768_v2, %v772_v3  ;;  %v820_v56 = vld [vmem:[#allocation7 + $0xcb0] sm:$0xff] }
 0x293   :  { %4112 = vmatprep.subr.bf16.mxu1 %v4592_v9  ;;  %v773_v8 = vld [vmem:[#allocation7 + $0xb38] sm:$0xff]  ;;  %v4637_v9 = vcombine.low %v760_v54, %v764_v60 }
 0x294   :  { %v4648_v12 = vcombine.high %v769_v6, %v773_v8  ;;  %v4647_v7 = vcombine.low %v769_v6, %v773_v8  ;;  %v824_v8 = vld [vmem:[#allocation7 + $0xcd0] sm:$0xff] }
 0x295   :  { %3949 = vmatpush1.bf16.msra.mxu0 %v4589_v18  ;;  %v780_v18 = vld [vmem:[#allocation7 + $0xb70] sm:$0xff] }
 0x296   :  { %4113 = vmatpush1.bf16.msra.mxu1 %v4591_v19  ;;  %3950 = vmatprep.subr.bf16.mxu0 %v4598_v20  ;;  %v777_v19 = vld [vmem:[#allocation7 + $0xb58] sm:$0xff]  ;;  %v4654_v62 = vcombine.high %v776_v17, %v780_v18 }
 0x297   :  { %4114 = vmatprep.subr.bf16.mxu1 %v4600_v21  ;;  %v781_v20 = vld [vmem:[#allocation7 + $0xb78] sm:$0xff]  ;;  %v4645_v21 = vcombine.low %v768_v2, %v772_v3  ;;  %v4694_v3 = vcombine.high %v816_v55, %v820_v56 }
 0x298   :  { %v4656_v22 = vcombine.high %v777_v19, %v781_v20  ;;  %v4655_v27 = vcombine.low %v777_v19, %v781_v20  ;;  %v832_v19 = vld [vmem:[#allocation7 + $0xd10] sm:$0xff] }
 0x299   :  { %3951 = vmatpush1.bf16.msra.mxu0 %v4597_v25  ;;  %v788_v25 = vld [vmem:[#allocation7 + $0xbb0] sm:$0xff] }
 0x29a   :  { %4115 = vmatpush1.bf16.msra.mxu1 %v4599_v26  ;;  %3952 = vmatprep.subr.bf16.mxu0 %v4606_v46  ;;  %v785_v26 = vld [vmem:[#allocation7 + $0xb98] sm:$0xff]  ;;  %v4662_v15 = vcombine.high %v784_v23, %v788_v25  ;;  %v836_v20 = vld [vmem:[#allocation7 + $0xd30] sm:$0xff] }
 0x29b   :  { %4116 = vmatprep.subr.bf16.mxu1 %v4608_v14  ;;  %v789_v46 = vld [vmem:[#allocation7 + $0xbb8] sm:$0xff]  ;;  %v4653_v14 = vcombine.low %v776_v17, %v780_v18 }
 0x29c   :  { %v4664_v28 = vcombine.high %v785_v26, %v789_v46  ;;  %v4663_v35 = vcombine.low %v785_v26, %v789_v46  ;;  %v844_v26 = vld [vmem:[#allocation7 + $0xd70] sm:$0xff]  ;;  %v841_v46 = vld [vmem:[#allocation7 + $0xd58] sm:$0xff] }
 0x29d   :  { %3953 = vmatpush1.bf16.msra.mxu0 %v4605_v30  ;;  %v796_v30 = vld [vmem:[#allocation7 + $0xbf0] sm:$0xff] }
 0x29e   :  { %4117 = vmatpush1.bf16.msra.mxu1 %v4607_v31  ;;  %3954 = vmatprep.subr.bf16.mxu0 %v4614_v32  ;;  %v793_v31 = vld [vmem:[#allocation7 + $0xbd8] sm:$0xff]  ;;  %v4670_v4 = vcombine.high %v792_v29, %v796_v30 }
 0x29f   :  { %4118 = vmatprep.subr.bf16.mxu1 %v4616_v33  ;;  %v797_v32 = vld [vmem:[#allocation7 + $0xbf8] sm:$0xff]  ;;  %v4661_v33 = vcombine.low %v784_v23, %v788_v25  ;;  %v840_v25 = vld [vmem:[#allocation7 + $0xd50] sm:$0xff] }
 0x2a0   :  { %v4672_v37 = vcombine.high %v793_v31, %v797_v32  ;;  %v4671_v43 = vcombine.low %v793_v31, %v797_v32  ;;  %v848_v31 = vld [vmem:[#allocation7 + $0xd90] sm:$0xff] }
 0x2a1   :  { %3955 = vmatpush1.bf16.msra.mxu0 %v4613_v39  ;;  %v804_v39 = vld [vmem:[#allocation7 + $0xc30] sm:$0xff] }
 0x2a2   :  { %4119 = vmatpush1.bf16.msra.mxu1 %v4615_v57  ;;  %3956 = vmatprep.subr.bf16.mxu0 %v4622_v40  ;;  %v801_v57 = vld [vmem:[#allocation7 + $0xc18] sm:$0xff]  ;;  %v4678_v50 = vcombine.high %v800_v38, %v804_v39  ;;  %v852_v32 = vld [vmem:[#allocation7 + $0xdb0] sm:$0xff] }
 0x2a3   :  { %4120 = vmatprep.subr.bf16.mxu1 %v4624_v42  ;;  %v805_v40 = vld [vmem:[#allocation7 + $0xc38] sm:$0xff]  ;;  %v4669_v42 = vcombine.low %v792_v29, %v796_v30  ;;  %v4718_v29 = vcombine.high %v840_v25, %v844_v26 }
 0x2a4   :  { %v4680_v51 = vcombine.high %v801_v57, %v805_v40  ;;  %v4679_v54 = vcombine.low %v801_v57, %v805_v40  ;;  %v4717_v40 = vcombine.low %v840_v25, %v844_v26 }
 0x2a5   :  { %3957 = vmatpush1.bf16.msra.mxu0 %v4621_v52  ;;  %v812_v52 = vld [vmem:[#allocation7 + $0xc70] sm:$0xff] }
 0x2a6   :  { %4121 = vmatpush1.bf16.msra.mxu1 %v4623_v16  ;;  %3958 = vmatprep.subr.bf16.mxu0 %v4630_v53  ;;  %v4677_v16 = vcombine.low %v800_v38, %v804_v39  ;;  %v809_v53 = vld [vmem:[#allocation7 + $0xc58] sm:$0xff]  ;;  %v4686_v60 = vcombine.high %v808_v5, %v812_v52  ;;  %v5212_v38 = vld [vmem:[#allocation10] sm:$0xff] }
 0x2a7   :  { %4122 = vmatprep.subr.bf16.mxu1 %v4632_v44  ;;  %v813_v44 = vld [vmem:[#allocation7 + $0xc78] sm:$0xff] }
 0x2a8   :  { %v4687_v2 = vcombine.low %v809_v53, %v813_v44 }
 0x2a9   :  { %3959 = vmatpush1.bf16.msra.mxu0 %v4629_v58  ;;  %v4688_v58 = vcombine.high %v809_v53, %v813_v44  ;;  %v4197_v44 = vrot.slane %v5212_v38, %v5105_v45 }
 0x2aa   :  { %4123 = vmatpush1.bf16.msra.mxu1 %v4631_v61  ;;  %3960 = vmatprep.subr.bf16.mxu0 %v4638_v63  ;;  %v817_v61 = vld [vmem:[#allocation7 + $0xc98] sm:$0xff] }
 0x2ab   :  { %4124 = vmatprep.subr.bf16.mxu1 %v4640_v0  ;;  %v821_v63 = vld [vmem:[#allocation7 + $0xcb8] sm:$0xff]  ;;  %v4685_v0 = vcombine.low %v808_v5, %v812_v52  ;;  %v856_v52 = vld [vmem:[#allocation7 + $0xdd0] sm:$0xff] }
 0x2ac   :  { %v4696_v6 = vcombine.high %v817_v61, %v821_v63 }
 0x2ad   :  { %3961 = vmatpush1.bf16.msra.mxu0 %v4637_v9  ;;  %v828_v9 = vld [vmem:[#allocation7 + $0xcf0] sm:$0xff] }
 0x2ae   :  { %4125 = vmatpush1.bf16.msra.mxu1 %v4639_v10  ;;  %3962 = vmatprep.subr.bf16.mxu0 %v4646_v11  ;;  %v825_v10 = vld [vmem:[#allocation7 + $0xcd8] sm:$0xff]  ;;  %v4702_v17 = vcombine.high %v824_v8, %v828_v9 }
 0x2af   :  { %4126 = vmatprep.subr.bf16.mxu1 %v4648_v12  ;;  %v829_v11 = vld [vmem:[#allocation7 + $0xcf8] sm:$0xff]  ;;  %v4693_v12 = vcombine.low %v816_v55, %v820_v56 }
 0x2b0   :  { %v4704_v18 = vcombine.high %v825_v10, %v829_v11  ;;  %v857_v56 = vld [vmem:[#allocation7 + $0xdd8] sm:$0xff] }
 0x2b1   :  { %3963 = vmatpush1.bf16.msra.mxu0 %v4645_v21  ;;  %v833_v21 = vld [vmem:[#allocation7 + $0xd18] sm:$0xff] }
 0x2b2   :  { %4127 = vmatpush1.bf16.msra.mxu1 %v4647_v7  ;;  %3964 = vmatprep.subr.bf16.mxu0 %v4654_v62  ;;  %v837_v7 = vld [vmem:[#allocation7 + $0xd38] sm:$0xff]  ;;  %v4703_v62 = vcombine.low %v825_v10, %v829_v11 }
 0x2b3   :  { %4128 = vmatprep.subr.bf16.mxu1 %v4656_v22  ;;  %v4710_v22 = vcombine.high %v832_v19, %v836_v20  ;;  %v4712_v23 = vcombine.high %v833_v21, %v837_v7 }
 0x2b5   :  { %3965 = vmatpush1.bf16.msra.mxu0 %v4653_v14  ;;  %v845_v14 = vld [vmem:[#allocation7 + $0xd78] sm:$0xff] }
 0x2b6   :  { %4129 = vmatpush1.bf16.msra.mxu1 %v4655_v27  ;;  %3966 = vmatprep.subr.bf16.mxu0 %v4662_v15  ;;  %v4709_v27 = vcombine.low %v832_v19, %v836_v20  ;;  %v5206_v15 = vld [vmem:[#allocation8] sm:$0xff]  ;;  %v4720_v30 = vcombine.high %v841_v46, %v845_v14  ;;  %v868_v19 = vld [vmem:[#allocation7 + $0xe30] sm:$0xff] }
 0x2b7   :  { %4130 = vmatprep.subr.bf16.mxu1 %v4664_v28  ;;  %v4711_v28 = vcombine.low %v833_v21, %v837_v7  ;;  %v935_v39 = vrot.slane %v5206_v15, %v5110_v47  ;;  %v943_v57 = vrot.slane %v5206_v15, %v5113_v48  ;;  %v865_v21 = vld [vmem:[#allocation7 + $0xe18] sm:$0xff] }
 0x2b8   :  { %v869_v7 = vld [vmem:[#allocation7 + $0xe38] sm:$0xff] }
 0x2b9   :  { %3967 = vmatpush1.bf16.msra.mxu0 %v4661_v33  ;;  %v931_v33 = vrot.slane %v5206_v15, %v5105_v45 }
 0x2ba   :  { %4131 = vmatpush1.bf16.msra.mxu1 %v4663_v35  ;;  %3968 = vmatprep.subr.bf16.mxu0 %v4670_v4  ;;  %v939_v35 = vrot.slane %v5206_v15, %v5144_v1  ;;  %v849_v4 = vld [vmem:[#allocation7 + $0xd98] sm:$0xff] }
 0x2bb   :  { %4132 = vmatprep.subr.bf16.mxu1 %v4672_v37  ;;  %v853_v37 = vld [vmem:[#allocation7 + $0xdb8] sm:$0xff] }
 0x2bc   :  { %v4728_v5 = vcombine.high %v849_v4, %v853_v37  ;;  %v4727_v45 = vcombine.low %v849_v4, %v853_v37 }
 0x2bd   :  { %3969 = vmatpush1.bf16.msra.mxu0 %v4669_v42  ;;  %v4719_v42 = vcombine.low %v841_v46, %v845_v14  ;;  %v4744_v14 = vcombine.high %v865_v21, %v869_v7 }
 0x2be   :  { %4133 = vmatpush1.bf16.msra.mxu1 %v4671_v43  ;;  %3979 = vmatprep.subr.bf16.mxu0 %v4678_v50  ;;  %v4726_v43 = vcombine.high %v848_v31, %v852_v32 }
 0x2bf   :  { %4143 = vmatprep.subr.bf16.mxu1 %v4680_v51 }
 0x2c0   :  { %3971 = vmatmul.mubr.bf16.vlgmr.msra.gmra.mrb[12].mxu0 %v5175_v34 }
 0x2c1   :  { %4135 = vmatmul.mubr.bf16.vlgmr.msra.gmra.mrb[12].mxu1 %v5175_v34  ;;  %3980 = vmatpush1.bf16.msra.mxu0 %v4677_v16  ;;  %v4695_v34 = vcombine.low %v817_v61, %v821_v63  ;;  %v860_v16 = vld [vmem:[#allocation7 + $0xdf0] sm:$0xff]  ;;  %v4201_v63 = vrot.slane %v5212_v38, %v5110_v47 }
 0x2c2   :  { %4011 = vmatprep.mubr.bf16.mxu0 %v5177_v41  ;;  %4144 = vmatpush1.bf16.msra.mxu1 %v4679_v54  ;;  %v4734_v11 = vcombine.high %v856_v52, %v860_v16  ;;  %v864_v47 = vld [vmem:[#allocation7 + $0xe10] sm:$0xff] }
 0x2c3   :  { %4175 = vmatprep.mubr.bf16.mxu1 %v5177_v41  ;;  %3981 = vmatprep.subr.bf16.mxu0 %v4686_v60  ;;  %v4701_v41 = vcombine.low %v824_v8, %v828_v9  ;;  %v4742_v26 = vcombine.high %v864_v47, %v868_v19 }
 0x2c4   :  { %4145 = vmatprep.subr.bf16.mxu1 %v4688_v58  ;;  %v861_v58 = vld [vmem:[#allocation7 + $0xdf8] sm:$0xff] }
 0x2c5   :  { %3982 = vmatpush1.bf16.msra.mxu0 %v4685_v0  ;;  %v4735_v25 = vcombine.low %v857_v56, %v861_v58 }
 0x2c6   :  { %4146 = vmatpush1.bf16.msra.mxu1 %v4687_v2  ;;  %3983 = vmatprep.subr.bf16.mxu0 %v4694_v3 }
 0x2c7   :  { %4147 = vmatprep.subr.bf16.mxu1 %v4696_v6  ;;  %v4725_v6 = vcombine.low %v848_v31, %v852_v32 }
 0x2c9   :  { %3984 = vmatpush1.bf16.msra.mxu0 %v4693_v12 }
 0x2ca   :  { %4148 = vmatpush1.bf16.msra.mxu1 %v4695_v34  ;;  %3985 = vmatprep.subr.bf16.mxu0 %v4702_v17  ;;  %v4205_v34 = vrot.slane %v5212_v38, %v5144_v1 }
 0x2cb   :  { %4149 = vmatprep.subr.bf16.mxu1 %v4704_v18  ;;  %v4736_v18 = vcombine.high %v857_v56, %v861_v58  ;;  %v896_v58 = vld [vmem:[#allocation7 + $0xf10] sm:$0xff] }
 0x2cd   :  { %3986 = vmatpush1.bf16.msra.mxu0 %v4701_v41 }
 0x2ce   :  { %4150 = vmatpush1.bf16.msra.mxu1 %v4703_v62  ;;  %3987 = vmatprep.subr.bf16.mxu0 %v4710_v22  ;;  %v4209_v22 = vrot.slane %v5212_v38, %v5113_v48  ;;  %v4743_v48 = vcombine.low %v865_v21, %v869_v7  ;;  %v917_v21 = vld [vmem:[#allocation7 + $0xfb8] sm:$0xff] }
 0x2cf   :  { %4151 = vmatprep.subr.bf16.mxu1 %v4712_v23  ;;  %v4733_v23 = vcombine.low %v856_v52, %v860_v16  ;;  %v888_v52 = vld [vmem:[#allocation7 + $0xed0] sm:$0xff] }
 0x2d0   :  { %v892_v16 = vld [vmem:[#allocation7 + $0xef0] sm:$0xff] }
 0x2d1   :  { %3988 = vmatpush1.bf16.msra.mxu0 %v4709_v27  ;;  %v872_v27 = vld [vmem:[#allocation7 + $0xe50] sm:$0xff] }
 0x2d2   :  { %4152 = vmatpush1.bf16.msra.mxu1 %v4711_v28  ;;  %3989 = vmatprep.subr.bf16.mxu0 %v4718_v29  ;;  %v876_v28 = vld [vmem:[#allocation7 + $0xe70] sm:$0xff]  ;;  %v873_v29 = vld [vmem:[#allocation7 + $0xe58] sm:$0xff] }
 0x2d3   :  { %v3685_v50 = vpop.f32.mrb[8].mxu0  ;;  %v3849_v51 = vpop.f32.mrb[8].mxu1  ;;  %4153 = vmatprep.subr.bf16.mxu1 %v4720_v30  ;;  %v877_v30 = vld [vmem:[#allocation7 + $0xe78] sm:$0xff] }
 0x2d4   :  { %v4802_v53 = vadd.f32 %v3685_v50, %v931_v33  ;;  %v4804_v54 = vadd.f32 %v3849_v51, %v939_v35  ;;  %v3687_v60 = vpop.f32.mrb[9].mxu0  ;;  %v3851_v55 = vpop.f32.mrb[9].mxu1  ;;  %v4741_v33 = vcombine.low %v864_v47, %v868_v19  ;;  %v4750_v35 = vcombine.high %v872_v27, %v876_v28  ;;  %v912_v47 = vld [vmem:[#allocation7 + $0xf90] sm:$0xff] }
 0x2d5   :  { %v4803_v61 = vadd.f32 %v3687_v60, %v935_v39  ;;  %v4805_v0 = vadd.f32 %v3851_v55, %v943_v57  ;;  %v3689_v2 = vpop.f32.mrb[10].mxu0  ;;  %v3853_v3 = vpop.f32.mrb[10].mxu1  ;;  %3990 = vmatpush1.bf16.msra.mxu0 %v4717_v40  ;;  %v4752_v37 = vcombine.high %v873_v29, %v877_v30  ;;  %v880_v39 = vld [vmem:[#allocation7 + $0xe90] sm:$0xff]  ;;  %v881_v40 = vld [vmem:[#allocation7 + $0xe98] sm:$0xff]  ;;  %v4751_v50 = vcombine.low %v873_v29, %v877_v30 }
 0x2d6   :  { %v4184_v8 = vmax.f32 %v4802_v53, 0.0  ;;  %4154 = vmatpush1.bf16.msra.mxu1 %v4719_v42  ;;  %v3690_v9 = vpop.f32.mrb[11].mxu0  ;;  %v3854_v10 = vpop.f32.mrb[11].mxu1  ;;  %3991 = vmatprep.subr.bf16.mxu0 %v4726_v43  ;;  %v4186_v12 = vmax.f32 %v4804_v54, 0.0  ;;  %v884_v57 = vld [vmem:[#allocation7 + $0xeb0] sm:$0xff]  ;;  %v885_v42 = vld [vmem:[#allocation7 + $0xeb8] sm:$0xff]  ;;  %v4749_v43 = vcombine.low %v872_v27, %v876_v28  ;;  %v4766_v55 = vcombine.high %v888_v52, %v892_v16 }
 0x2d7   :  { %v4185_v17 = vmax.f32 %v4803_v61, 0.0  ;;  %4155 = vmatprep.subr.bf16.mxu1 %v4728_v5  ;;  %v4187_v62 = vmax.f32 %v4805_v0, 0.0  ;;  %v4758_v51 = vcombine.high %v880_v39, %v884_v57  ;;  %v4760_v5 = vcombine.high %v881_v40, %v885_v42  ;;  %v889_v53 = vld [vmem:[#allocation7 + $0xed8] sm:$0xff]  ;;  %v900_v61 = vld [vmem:[#allocation7 + $0xf30] sm:$0xff] }
 0x2d8   :  { %v4234_v20 = vmul.f32 %v4197_v44, %v4184_v8  ;;  %v4236_v1 = vmul.f32 %v4205_v34, %v4186_v12  ;;  %v893_v44 = vld [vmem:[#allocation7 + $0xef8] sm:$0xff]  ;;  %v4757_v54 = vcombine.low %v880_v39, %v884_v57  ;;  %v4759_v60 = vcombine.low %v881_v40, %v885_v42  ;;  %v904_v9 = vld [vmem:[#allocation7 + $0xf50] sm:$0xff] }
 0x2d9   :  { %v4235_v41 = vmul.f32 %v4201_v63, %v4185_v17  ;;  %3992 = vmatpush1.bf16.msra.mxu0 %v4725_v6  ;;  %v4237_v31 = vmul.f32 %v4209_v22, %v4187_v62  ;;  %v4768_v56 = vcombine.high %v889_v53, %v893_v44  ;;  %v897_v63 = vld [vmem:[#allocation7 + $0xf18] sm:$0xff]  ;;  %v4765_v2 = vcombine.low %v888_v52, %v892_v16  ;;  %v908_v10 = vld [vmem:[#allocation7 + $0xf70] sm:$0xff] }
 0x2da   :  { %4156 = vmatpush1.bf16.msra.mxu1 %v4727_v45  ;;  %3993 = vmatprep.subr.bf16.mxu0 %v4734_v11  ;;  %v901_v0 = vld [vmem:[#allocation7 + $0xf38] sm:$0xff]  ;;  %v4767_v3 = vcombine.low %v889_v53, %v893_v44  ;;  %v4774_v6 = vcombine.high %v896_v58, %v900_v61  ;;  %v4773_v12 = vcombine.low %v896_v58, %v900_v61  ;;  %v916_v19 = vld [vmem:[#allocation7 + $0xfb0] sm:$0xff] }
 0x2db   :  { %v4242_v46 = vadd.f32 %v4235_v41, %v4234_v20  ;;  %4157 = vmatprep.subr.bf16.mxu1 %v4736_v18  ;;  %v4776_v8 = vcombine.high %v897_v63, %v901_v0  ;;  %v905_v45 = vld [vmem:[#allocation7 + $0xf58] sm:$0xff]  ;;  %v4775_v34 = vcombine.low %v897_v63, %v901_v0  ;;  %v4782_v17 = vcombine.high %v904_v9, %v908_v10 }
 0x2dc   :  { %v909_v11 = vld [vmem:[#allocation7 + $0xf78] sm:$0xff]  ;;  %v4781_v7 = vcombine.low %v904_v9, %v908_v10  ;;  %v4790_v62 = vcombine.high %v912_v47, %v916_v19  ;;  %v4213_v39 = vrot.slane %v5212_v38, %v5164_v49 }
 0x2dd   :  { %v4243_v32 = vadd.f32 %v4242_v46, %v4236_v1  ;;  %3994 = vmatpush1.bf16.msra.mxu0 %v4733_v23  ;;  %v4784_v18 = vcombine.high %v905_v45, %v909_v11  ;;  %v913_v20 = vld [vmem:[#allocation7 + $0xf98] sm:$0xff]  ;;  %v4783_v41 = vcombine.low %v905_v45, %v909_v11  ;;  %v920_v23 = vld [vmem:[#allocation7 + $0xfd0] sm:$0xff]  ;;  %v4789_v46 = vcombine.low %v912_v47, %v916_v19 }
 0x2de   :  { %4158 = vmatpush1.bf16.msra.mxu1 %v4735_v25  ;;  %3995 = vmatprep.subr.bf16.mxu0 %v4742_v26  ;;  %v4792_v22 = vcombine.high %v913_v20, %v917_v21  ;;  %v924_v25 = vld [vmem:[#allocation7 + $0xff0] sm:$0xff]  ;;  %v921_v26 = vld [vmem:[#allocation7 + $0xfd8] sm:$0xff] }
 0x2df   :  { %v5226_v4 = vadd.f32 %v4243_v32, %v4237_v31  ;;  %4159 = vmatprep.subr.bf16.mxu1 %v4744_v14  ;;  %v925_v1 = vld [vmem:[#allocation7 + $0xff8] sm:$0xff]  ;;  %v4791_v14 = vcombine.low %v913_v20, %v917_v21  ;;  %v4798_v27 = vcombine.high %v920_v23, %v924_v25  ;;  %v4797_v29 = vcombine.low %v920_v23, %v924_v25 }
 0x2e0   :  { %v4800_v28 = vcombine.high %v921_v26, %v925_v1  ;;  %v4799_v30 = vcombine.low %v921_v26, %v925_v1  ;;  %v947_v31 = vrot.slane %v5206_v15, %v5164_v49  ;;  %v955_v32 = vrot.slane %v5206_v15, %v5184_v36 }
 0x2e1   :  { %3996 = vmatpush1.bf16.msra.mxu0 %v4741_v33  ;;  %v951_v33 = vrot.slane %v5206_v15, %v5147_v13  ;;  %v4221_v49 = vrot.slane %v5212_v38, %v5184_v36 }
 0x2e2   :  { %4160 = vmatpush1.bf16.msra.mxu1 %v4743_v48  ;;  %3997 = vmatprep.subr.bf16.mxu0 %v4750_v35  ;;  %v959_v48 = vrot.slane %v5206_v15, %v5167_v59 }
 0x2e3   :  { %4161 = vmatprep.subr.bf16.mxu1 %v4752_v37 }
 0x2e5   :  { %3998 = vmatpush1.bf16.msra.mxu0 %v4749_v43  ;;  %v4217_v43 = vrot.slane %v5212_v38, %v5147_v13  ;;  %v4225_v13 = vrot.slane %v5212_v38, %v5167_v59 }
 0x2e6   :  { %4162 = vmatpush1.bf16.msra.mxu1 %v4751_v50  ;;  %3999 = vmatprep.subr.bf16.mxu0 %v4758_v51 }
 0x2e7   :  { %4163 = vmatprep.subr.bf16.mxu1 %v4760_v5 }
 0x2e9   :  { %4000 = vmatpush1.bf16.msra.mxu0 %v4757_v54 }
 0x2ea   :  { %4164 = vmatpush1.bf16.msra.mxu1 %v4759_v60  ;;  %4001 = vmatprep.subr.bf16.mxu0 %v4766_v55 }
 0x2eb   :  { %4165 = vmatprep.subr.bf16.mxu1 %v4768_v56 }
 0x2ed   :  { %4002 = vmatpush1.bf16.msra.mxu0 %v4765_v2 }
 0x2ee   :  { %4166 = vmatpush1.bf16.msra.mxu1 %v4767_v3  ;;  %4003 = vmatprep.subr.bf16.mxu0 %v4774_v6  ;;  %v4252_v6 = vstv %s5259_s6 }
 0x2ef   :  { %4167 = vmatprep.subr.bf16.mxu1 %v4776_v8 }
 0x2f1   :  { %4004 = vmatpush1.bf16.msra.mxu0 %v4773_v12 }
 0x2f2   :  { %4168 = vmatpush1.bf16.msra.mxu1 %v4775_v34  ;;  %4005 = vmatprep.subr.bf16.mxu0 %v4782_v17 }
 0x2f3   :  { %4169 = vmatprep.subr.bf16.mxu1 %v4784_v18 }
 0x2f5   :  { %4006 = vmatpush1.bf16.msra.mxu0 %v4781_v7 }
 0x2f6   :  { %4170 = vmatpush1.bf16.msra.mxu1 %v4783_v41  ;;  %4007 = vmatprep.subr.bf16.mxu0 %v4790_v62 }
 0x2f7   :  { %4171 = vmatprep.subr.bf16.mxu1 %v4792_v22 }
 0x2f9   :  { %4008 = vmatpush1.bf16.msra.mxu0 %v4789_v46 }
 0x2fa   :  { %4172 = vmatpush1.bf16.msra.mxu1 %v4791_v14  ;;  %4009 = vmatprep.subr.bf16.mxu0 %v4798_v27 }
 0x2fb   :  { %4173 = vmatprep.subr.bf16.mxu1 %v4800_v28 }
 0x2fd   :  { %4010 = vmatpush1.bf16.msra.mxu0 %v4797_v29 }
 0x2fe   :  { %4174 = vmatpush1.bf16.msra.mxu1 %v4799_v30 }
 0x300   :  { %4012 = vmatmul.mubr.bf16.vlgmr.msra.gmra.mrb[12].mxu0 %v5188_v24 }
 0x301   :  { %4176 = vmatmul.mubr.bf16.vlgmr.msra.gmra.mrb[12].mxu1 %v5188_v24 }
 0x3d3   :  { %v4013_v35 = vpop.f32.mrb[12].mxu0 }
 0x3d4   :  { %v4806_v37 = vadd.f32 %v4013_v35, %v947_v31  ;;  %v4177_v57 = vpop.f32.mrb[12].mxu1  ;;  %v4015_v40 = vpop.f32.mrb[13].mxu0 }
 0x3d5   :  { %v4808_v24 = vadd.f32 %v4177_v57, %v955_v32  ;;  %v4807_v42 = vadd.f32 %v4015_v40, %v951_v33  ;;  %v4179_v50 = vpop.f32.mrb[13].mxu1  ;;  %v4017_v51 = vpop.f32.mrb[14].mxu0 }
 0x3d6   :  { %v4188_v5 = vmax.f32 %v4806_v37, 0.0  ;;  %v4809_v52 = vadd.f32 %v4179_v50, %v959_v48  ;;  %v4181_v16 = vpop.f32.mrb[14].mxu1  ;;  %v4018_v53 = vpop.f32.mrb[15].mxu0 }
 0x3d7   :  { %v4189_v44 = vmax.f32 %v4807_v42, 0.0  ;;  %v4182_v15 = vpop.f32.mrb[15].mxu1  ;;  %v4190_v60 = vmax.f32 %v4808_v24, 0.0 }
 0x3d8   :  { %v4238_v54 = vmul.f32 %v4213_v39, %v4188_v5  ;;  %v4191_v58 = vmax.f32 %v4809_v52, 0.0 }
 0x3d9   :  { %v4239_v55 = vmul.f32 %v4217_v43, %v4189_v44  ;;  %v4240_v61 = vmul.f32 %v4221_v49, %v4190_v60 }
 0x3da   :  { %v4245_v56 = vadd.f32 %v5226_v4, %v4238_v54  ;;  %v4241_v0 = vmul.f32 %v4225_v13, %v4191_v58 }
 0x3dc   :  { %v4246_v63 = vadd.f32 %v4245_v56, %v4239_v55 }
 0x3de   :  { %v4247_v2 = vadd.f32 %v4246_v63, %v4240_v61 }
 0x3e0   :  { %v4248_v3 = vadd.f32 %v4247_v2, %v4241_v0 }
 0x3e2   :  { %4249 = vadd.xlane.f32.xlu0 %v4248_v3 }
 0x46f   :  { %v4250_v8 = vpop.xlane.xlu0 %4249 }
 0x470   :  { %v4253_v9 = vadd.f32 %v4252_v6, %v4250_v8 }
 0x472   :  { %v4801_v36 = vmul.f32 -1.442695, %v4253_v9 }
 0x474   :  { %4866 = vpow2.f32 %v4801_v36 }
 0x47e   :  { %v4867_v10 = vpop.eup %4866 }
 0x47f   :  { %v4257_v4 = vadd.f32 1.0, %v4867_v10 }
 0x481   :  { %4868 = vrcp.f32 %v4257_v4 }
 0x48b   :  { %v4869_v45 = vpop.eup %4868 }
 0x48c   :  { %4261 = vst.msk [vmem:[%s5260_s7] sm:$0xff] %vm4260_vm1, %v4869_v45 }
 0x48d   :  { %4266 = vsyncpa [#allocation4], 1 }
 0x48e   :  { %4267 = vsyncpa [#allocation6], 1 }
 0x48f   :  { %4268 = vsyncpa [#allocation9], 1 }

</bundles_post_ra>
